<compile_context>
chip_gen: v7x
topology: tpu7x:2x2x1
jax: 0.10.0
libtpu: 0.0.40
codegen_flags: <defaults>
</compile_context>

<pallas_src>
import numpy as np
import jax
import jax.numpy as jnp
from jax import lax
from jax.experimental import pallas as pl
from jax.experimental.pallas import tpu as pltpu


LANE = 128            # TPU lane width: K / feature / class dims are zero-padded to this
HIDDEN = 1024
N_CLASSES = 17
NUM_FEATURES = 32     # stand-in backbone feature width


def _round_up(x, m):
    return ((x + m - 1) // m) * m


# ----------------------------------------------------------------------------
# Fused kernel: im2col-conv (one matmul) + ReLU + running avg-pool +
# (BN-folded) classifier head.  grid = (B // TB,): TB images per program.
# ----------------------------------------------------------------------------
def fused_forward_kernel(xcol_ref, wc_ref, bc_ref, w1_ref, b1_ref, w2_ref, b2_ref, o_ref):
    # xcol_ref: (TB, HW, K_pad) bf16     wc_ref: (K_pad, F_pad) bf16   bc_ref: (1, F_pad) f32
    # w1_ref:   (F_pad, HIDDEN) bf16     b1_ref: (1, HIDDEN) f32
    # w2_ref:   (HIDDEN, NCLS_pad) bf16  b2_ref: (1, NCLS_pad) f32
    # o_ref:    (TB, NCLS_pad) f32
    tb, hw, k_pad = xcol_ref.shape
    f_pad = wc_ref.shape[1]

    # Row-tile the spatial dim: keep the live conv activation at ~(256, F_pad) f32 per
    # step instead of materializing the full (TB*HW, F_pad) slab.
    row_tile = hw
    while tb * row_tile > 256 and row_tile % 32 == 0:
        row_tile //= 2
    n_tiles = hw // row_tile

    wc = wc_ref[...]          # grid-invariant loads hoisted out of the loop
    bc = bc_ref[...]

    def body(t, pool):
        start = pl.multiple_of(t * row_tile, row_tile)
        xs = xcol_ref[:, pl.ds(start, row_tile), :]                  # (TB, R, K_pad) bf16
        xs2 = xs.reshape(tb * row_tile, k_pad)                       # fold TB into matmul M
        s = jnp.dot(xs2, wc, preferred_element_type=jnp.float32)     # one lane-dense conv matmul
        s = jnp.maximum(s + bc, 0.0)                                 # bias + ReLU (f32 VPU)
        s = s.reshape(tb, row_tile, f_pad)
        return pool + jnp.sum(s, axis=1)                             # XLU cross-sublane sum

    pool = lax.fori_loop(0, n_tiles, body,
                         jnp.zeros((tb, f_pad), jnp.float32), unroll=True)
    feat = pool * (1.0 / hw)                                         # global average pool, f32

    # --- dropout (eval) = identity ---

    # --- classifier head: Linear(+folded BN) -> ReLU -> Dropout(id) -> Linear ---
    h = jnp.dot(feat.astype(jnp.bfloat16), w1_ref[...],
                preferred_element_type=jnp.float32)
    h = jnp.maximum(h + b1_ref[...], 0.0)                            # (TB, HIDDEN) f32
    out = jnp.dot(h.astype(jnp.bfloat16), w2_ref[...],
                  preferred_element_type=jnp.float32)
    o_ref[...] = (out + b2_ref[...]).astype(o_ref.dtype)             # lane-dense store


# ----------------------------------------------------------------------------
# Full forward (TimmWrapper.forward equivalent, eval mode).
# ----------------------------------------------------------------------------
@jax.jit
def timm_wrapper_forward(x_nchw, params):
    b, c, h, w = x_nchw.shape
    hw = h * w
    wc, bc = params["wc"], params["bc"]
    w1, b1 = params["w1_folded"], params["b1_folded"]
    w2, b2 = params["w2"], params["b2"]
    k_pad, f_pad = wc.shape
    hidden = w1.shape[1]
    ncls_pad = w2.shape[1]

    # --- im2col: pack the nine 3x3 taps into a lane-dense (B, HW, K_pad) bf16 operand ---
    # (~64 KB/image at these sizes; bf16 halves the kernel's input DMA).
    # TODO(synk): at production image sizes produce this layout once outside the hot path
    # (or DMA the raw image and synthesize the 1-pixel halo in-kernel).
    x_nhwc = jnp.transpose(x_nchw, (0, 2, 3, 1))
    xpad = jnp.pad(x_nhwc, ((0, 0), (1, 1), (1, 1), (0, 0)))
    taps = [xpad[:, di:di + h, dj:dj + w, :] for di in range(3) for dj in range(3)]
    xcol = jnp.concatenate(taps, axis=-1).reshape(b, hw, 9 * c)
    xcol = jnp.pad(xcol, ((0, 0), (0, 0), (0, k_pad - 9 * c))).astype(jnp.bfloat16)

    # --- batch tile: fold TB images into the matmul M dim; amortize grid-step overhead ---
    tb = 1
    for cand in range(min(b, 8), 0, -1):
        if b % cand == 0:
            tb = cand
            break
    grid = (b // tb,)   # becomes >=2 "parallel" blocks (both v7x TCs) once B > TB

    in_blocks = [
        ((tb, hw, k_pad), jnp.bfloat16, lambda i: (i, 0, 0)),        # per-step image tile
        ((k_pad, f_pad), jnp.bfloat16, lambda i: (0, 0)),            # grid-invariant weights
        ((1, f_pad), jnp.float32, lambda i: (0, 0)),
        ((f_pad, hidden), jnp.bfloat16, lambda i: (0, 0)),
        ((1, hidden), jnp.float32, lambda i: (0, 0)),
        ((hidden, ncls_pad), jnp.bfloat16, lambda i: (0, 0)),
        ((1, ncls_pad), jnp.float32, lambda i: (0, 0)),
    ]
    out_block = ((tb, ncls_pad), jnp.float32)

    # Right-size the scoped VMEM limit from actual double-buffered block totals (plus
    # headroom for compiler-internal scratch) instead of a blanket 32 MiB.
    # NOTE: the weight blocks are grid-invariant; single-buffering them would roughly
    # halve this again at realistic sizes on v7x.
    def _nbytes(shape, dtype):
        return int(np.prod(shape)) * np.dtype(dtype).itemsize
    block_bytes = sum(_nbytes(s, d) for s, d, _ in in_blocks) + _nbytes(*out_block)
    vmem_limit = int(max(8 * 1024 * 1024, 2 * block_bytes + (2 << 20)))

    out_pad = pl.pallas_call(
        fused_forward_kernel,
        out_shape=jax.ShapeDtypeStruct((b, ncls_pad), jnp.float32),
        grid=grid,
        in_specs=[pl.BlockSpec(s, im) for s, _, im in in_blocks],
        out_specs=pl.BlockSpec(out_block[0], lambda i: (i, 0)),
        compiler_params=pltpu.CompilerParams(
            dimension_semantics=("parallel",),
            vmem_limit_bytes=vmem_limit,
        ),
    )(xcol, wc, bc, w1, b1, w2, b2)
    return out_pad[:, :N_CLASSES]                                    # (B, 17)


# ----------------------------------------------------------------------------
# Parameters: PyTorch-like init, then BN-fold + lane-pad + bf16 cast.
# ----------------------------------------------------------------------------
def prepare_params(raw, eps=1e-5, lane=LANE):
    """Fold eval-mode BatchNorm1d into Linear1, zero-pad K/feature/class dims to lane
    width, cast matmul operands to bf16 (accumulation stays f32 in-kernel)."""
    kkc, num_features = raw["wc"].shape            # kkc = 9 * in_ch
    n_classes = raw["w2"].shape[1]
    k_pad = _round_up(kkc, lane)
    f_pad = _round_up(num_features, lane)
    c_pad = _round_up(n_classes, lane)

    # BN(eval): y = (W1 x + b1 - mu) * gamma / sqrt(var + eps) + beta
    scale = raw["bn_gamma"] * lax.rsqrt(raw["bn_var"] + eps)
    w1_f = raw["w1"] * scale[None, :]
    b1_f = (raw["b1"] - raw["bn_mean"]) * scale + raw["bn_beta"]

    # Zero-padding is exact: padded K rows multiply zero input columns, padded feature
    # channels stay exactly 0 through ReLU, padded logits equal 0 and are sliced off.
    wc_p = jnp.pad(raw["wc"], ((0, k_pad - kkc), (0, f_pad - num_features)))
    bc_p = jnp.pad(raw["bc"], (0, f_pad - num_features))[None, :]
    w1_p = jnp.pad(w1_f, ((0, f_pad - num_features), (0, 0)))
    w2_p = jnp.pad(raw["w2"], ((0, 0), (0, c_pad - n_classes)))
    b2_p = jnp.pad(raw["b2"], (0, c_pad - n_classes))[None, :]

    return {
        "wc": wc_p.astype(jnp.bfloat16),             # (K_pad, F_pad)
        "bc": bc_p.astype(jnp.float32),              # (1, F_pad)
        "w1_folded": w1_p.astype(jnp.bfloat16),      # (F_pad, HIDDEN)
        "b1_folded": b1_f[None, :].astype(jnp.float32),
        "w2": w2_p.astype(jnp.bfloat16),             # (HIDDEN, NCLS_pad)
        "b2": b2_p.astype(jnp.float32),
    }


def init_raw_params(key, in_ch, num_features=NUM_FEATURES, hidden=HIDDEN,
                    n_classes=N_CLASSES):
    """Deterministic synthetic init (kaiming-uniform-ish weights, zero biases,
    non-trivial BN running stats so the BN fold is actually exercised)."""
    ks = jax.random.split(key, 6)

    def kaiming_uniform(k, shape, fan_in):
        bound = jnp.sqrt(6.0 / fan_in)
        return jax.random.uniform(k, shape, jnp.float32, -bound, bound)

    kkc = 9 * in_ch
    return {
        "wc": kaiming_uniform(ks[0], (kkc, num_features), kkc),
        "bc": jnp.zeros((num_features,), jnp.float32),
        "w1": kaiming_uniform(ks[1], (num_features, hidden), num_features),
        "b1": jnp.zeros((hidden,), jnp.float32),
        "bn_gamma": jnp.ones((hidden,), jnp.float32),
        "bn_beta": jnp.zeros((hidden,), jnp.float32),
        "bn_mean": 0.1 * jax.random.normal(ks[2], (hidden,), jnp.float32),
        "bn_var": 1.0 + 0.1 * jax.random.uniform(ks[3], (hidden,), jnp.float32),
        "w2": kaiming_uniform(ks[4], (hidden, n_classes), hidden),
        "b2": jnp.zeros((n_classes,), jnp.float32),
    }


def reference_forward(x_nchw, raw, eps=1e-5):
    """Pure-JAX f32 reference (explicit, unfolded BatchNorm1d)."""
    b, c, h, w = x_nchw.shape
    x_nhwc = jnp.transpose(x_nchw, (0, 2, 3, 1))
    xpad = jnp.pad(x_nhwc, ((0, 0), (1, 1), (1, 1), (0, 0)))
    taps = [xpad[:, di:di + h, dj:dj + w, :] for di in range(3) for dj in range(3)]
    xcol = jnp.concatenate(taps, axis=-1).reshape(b, h * w, 9 * c)
    s = jnp.maximum(jnp.einsum("bpk,kf->bpf", xcol, raw["wc"]) + raw["bc"], 0.0)
    feat = jnp.mean(s, axis=1)                                       # global avg pool
    z = feat @ raw["w1"] + raw["b1"]
    z = (z - raw["bn_mean"]) * raw["bn_gamma"] / jnp.sqrt(raw["bn_var"] + eps) + raw["bn_beta"]
    z = jnp.maximum(z, 0.0)
    return z @ raw["w2"] + raw["b2"]


if __name__ == "__main__":
    key = jax.random.PRNGKey(0)
    k_x, k_p = jax.random.split(key)

    B, C, H, W = 2, 4, 16, 16            # small NCHW input
    x = jax.random.normal(k_x, (B, C, H, W), jnp.float32)
    raw = init_raw_params(k_p, in_ch=C)
    params = prepare_params(raw)

    out = timm_wrapper_forward(x, params)
    out = jax.block_until_ready(out)

    assert out.shape == (B, N_CLASSES), out.shape
    assert bool(jnp.all(jnp.isfinite(out)))

    # Parity vs. f32 reference (kernel matmul operands are bf16 with f32 accumulation,
    # so the tolerance accounts for bf16 rounding).
    ref = reference_forward(x, raw)
    assert bool(jnp.all(jnp.abs(out - ref) <= 0.05 * jnp.abs(ref) + 0.12)), \
        float(jnp.max(jnp.abs(out - ref)))

    print("KERNEL_OK")
</pallas_src>

<mosaic_0001>
module attributes {stable_mosaic.version = 11 : i64} {
  func.func @fused_forward_kernel(%arg0: i32, %arg1: memref<2x256x128xbf16, #tpu.memory_space<vmem>>, %arg2: memref<128x128xbf16, #tpu.memory_space<vmem>>, %arg3: memref<1x128xf32, #tpu.memory_space<vmem>>, %arg4: memref<128x1024xbf16, #tpu.memory_space<vmem>>, %arg5: memref<1x1024xf32, #tpu.memory_space<vmem>>, %arg6: memref<1024x128xbf16, #tpu.memory_space<vmem>>, %arg7: memref<1x128xf32, #tpu.memory_space<vmem>>, %arg8: memref<2x128xf32, #tpu.memory_space<vmem>>) attributes {dimension_semantics = [#tpu.dimension_semantics<parallel>], iteration_bounds = array<i64: 1>, scalar_prefetch = 0 : i64, scratch_operands = 0 : i64, tpu.core_type = #tpu.core_type<tc>, window_params = [{transform_indices = @transform_0, window_bounds = array<i64: 2, 256, 128>}, {pipeline_mode = #tpu.pipeline_mode<synchronous>, transform_indices = @transform_1, window_bounds = array<i64: 128, 128>}, {pipeline_mode = #tpu.pipeline_mode<synchronous>, transform_indices = @transform_2, window_bounds = array<i64: 1, 128>}, {pipeline_mode = #tpu.pipeline_mode<synchronous>, transform_indices = @transform_3, window_bounds = array<i64: 128, 1024>}, {pipeline_mode = #tpu.pipeline_mode<synchronous>, transform_indices = @transform_4, window_bounds = array<i64: 1, 1024>}, {pipeline_mode = #tpu.pipeline_mode<synchronous>, transform_indices = @transform_5, window_bounds = array<i64: 1024, 128>}, {pipeline_mode = #tpu.pipeline_mode<synchronous>, transform_indices = @transform_6, window_bounds = array<i64: 1, 128>}, {transform_indices = @transform_7, window_bounds = array<i64: 2, 128>}]} {
    %c0 = arith.constant 0 : index
    %c0_0 = arith.constant 0 : index
    %0 = vector.load %arg2[%c0, %c0_0] : memref<128x128xbf16, #tpu.memory_space<vmem>>, vector<128x128xbf16>
    %c0_1 = arith.constant 0 : index
    %c0_2 = arith.constant 0 : index
    %1 = vector.load %arg3[%c0_1, %c0_2] : memref<1x128xf32, #tpu.memory_space<vmem>>, vector<1x128xf32>
    %cst = arith.constant 0.000000e+00 : f32
    %2 = vector.broadcast %cst : f32 to vector<2x128xf32>
    %c0_i32 = arith.constant 0 : i32
    %c128_i32 = arith.constant 128 : i32
    %3 = arith.muli %c0_i32, %c128_i32 : i32
    %4 = tpu.assume_multiple %3, 128 : i32
    %c0_3 = arith.constant 0 : index
    %5 = arith.index_cast %4 : i32 to index
    %c0_4 = arith.constant 0 : index
    %6 = vector.load %arg1[%c0_3, %5, %c0_4] : memref<2x256x128xbf16, #tpu.memory_space<vmem>>, vector<2x128x128xbf16>
    %7 = vector.shape_cast %6 : vector<2x128x128xbf16> to vector<256x128xbf16>
    %cst_5 = arith.constant dense<0.000000e+00> : vector<256x128xf32>
    %8 = tpu.matmul %7, %0, %cst_5 {dimension_numbers = #tpu.dot_dimension_numbers<[1], [0], [0], [1], [0, 0, 1, 1], [], []>} : vector<256x128xbf16>, vector<128x128xbf16>, vector<256x128xf32> -> vector<256x128xf32>
    %9 = vector.broadcast %1 : vector<1x128xf32> to vector<256x128xf32>
    %10 = arith.addf %8, %9 : vector<256x128xf32>
    %cst_6 = arith.constant 0.000000e+00 : f32
    %11 = vector.broadcast %cst_6 : f32 to vector<256x128xf32>
    %12 = arith.maximumf %10, %11 : vector<256x128xf32>
    %13 = vector.shape_cast %12 : vector<256x128xf32> to vector<2x128x128xf32>
    %cst_7 = arith.constant dense<0.000000e+00> : vector<2x128xf32>
    %14 = vector.multi_reduction <add>, %13, %cst_7 [1] : vector<2x128x128xf32> to vector<2x128xf32>
    %15 = arith.addf %2, %14 : vector<2x128xf32>
    %c1_i32 = arith.constant 1 : i32
    %c128_i32_8 = arith.constant 128 : i32
    %16 = arith.muli %c1_i32, %c128_i32_8 : i32
    %17 = tpu.assume_multiple %16, 128 : i32
    %c0_9 = arith.constant 0 : index
    %18 = arith.index_cast %17 : i32 to index
    %c0_10 = arith.constant 0 : index
    %19 = vector.load %arg1[%c0_9, %18, %c0_10] : memref<2x256x128xbf16, #tpu.memory_space<vmem>>, vector<2x128x128xbf16>
    %20 = vector.shape_cast %19 : vector<2x128x128xbf16> to vector<256x128xbf16>
    %cst_11 = arith.constant dense<0.000000e+00> : vector<256x128xf32>
    %21 = tpu.matmul %20, %0, %cst_11 {dimension_numbers = #tpu.dot_dimension_numbers<[1], [0], [0], [1], [0, 0, 1, 1], [], []>} : vector<256x128xbf16>, vector<128x128xbf16>, vector<256x128xf32> -> vector<256x128xf32>
    %22 = vector.broadcast %1 : vector<1x128xf32> to vector<256x128xf32>
    %23 = arith.addf %21, %22 : vector<256x128xf32>
    %cst_12 = arith.constant 0.000000e+00 : f32
    %24 = vector.broadcast %cst_12 : f32 to vector<256x128xf32>
    %25 = arith.maximumf %23, %24 : vector<256x128xf32>
    %26 = vector.shape_cast %25 : vector<256x128xf32> to vector<2x128x128xf32>
    %cst_13 = arith.constant dense<0.000000e+00> : vector<2x128xf32>
    %27 = vector.multi_reduction <add>, %26, %cst_13 [1] : vector<2x128x128xf32> to vector<2x128xf32>
    %28 = arith.addf %15, %27 : vector<2x128xf32>
    %c2_i32 = arith.constant 2 : i32
    %cst_14 = arith.constant 3.906250e-03 : f32
    %29 = vector.broadcast %cst_14 : f32 to vector<2x128xf32>
    %30 = arith.mulf %28, %29 : vector<2x128xf32>
    %31 = arith.truncf %30 : vector<2x128xf32> to vector<2x128xbf16>
    %c0_15 = arith.constant 0 : index
    %c0_16 = arith.constant 0 : index
    %32 = vector.load %arg4[%c0_15, %c0_16] : memref<128x1024xbf16, #tpu.memory_space<vmem>>, vector<128x1024xbf16>
    %cst_17 = arith.constant dense<0.000000e+00> : vector<2x1024xf32>
    %33 = tpu.matmul %31, %32, %cst_17 {dimension_numbers = #tpu.dot_dimension_numbers<[1], [0], [0], [1], [0, 0, 1, 1], [], []>} : vector<2x128xbf16>, vector<128x1024xbf16>, vector<2x1024xf32> -> vector<2x1024xf32>
    %c0_18 = arith.constant 0 : index
    %c0_19 = arith.constant 0 : index
    %34 = vector.load %arg5[%c0_18, %c0_19] : memref<1x1024xf32, #tpu.memory_space<vmem>>, vector<1x1024xf32>
    %35 = vector.broadcast %34 : vector<1x1024xf32> to vector<2x1024xf32>
    %36 = arith.addf %33, %35 : vector<2x1024xf32>
    %cst_20 = arith.constant 0.000000e+00 : f32
    %37 = vector.broadcast %cst_20 : f32 to vector<2x1024xf32>
    %38 = arith.maximumf %36, %37 : vector<2x1024xf32>
    %39 = arith.truncf %38 : vector<2x1024xf32> to vector<2x1024xbf16>
    %c0_21 = arith.constant 0 : index
    %c0_22 = arith.constant 0 : index
    %40 = vector.load %arg6[%c0_21, %c0_22] : memref<1024x128xbf16, #tpu.memory_space<vmem>>, vector<1024x128xbf16>
    %cst_23 = arith.constant dense<0.000000e+00> : vector<2x128xf32>
    %41 = tpu.matmul %39, %40, %cst_23 {dimension_numbers = #tpu.dot_dimension_numbers<[1], [0], [0], [1], [0, 0, 1, 1], [], []>} : vector<2x1024xbf16>, vector<1024x128xbf16>, vector<2x128xf32> -> vector<2x128xf32>
    %c0_24 = arith.constant 0 : index
    %c0_25 = arith.constant 0 : index
    %42 = vector.load %arg7[%c0_24, %c0_25] : memref<1x128xf32, #tpu.memory_space<vmem>>, vector<1x128xf32>
    %43 = vector.broadcast %42 : vector<1x128xf32> to vector<2x128xf32>
    %44 = arith.addf %41, %43 : vector<2x128xf32>
    %c0_26 = arith.constant 0 : index
    %c0_27 = arith.constant 0 : index
    %45 = vector.load %arg8[%c0_26, %c0_27] : memref<2x128xf32, #tpu.memory_space<vmem>>, vector<2x128xf32>
    tpu.vector_store %arg8[%c0_26, %c0_27], %44 {strides = array<i32>} : memref<2x128xf32, #tpu.memory_space<vmem>>, vector<2x128xf32>,
    return
  }
  func.func @transform_0(%arg0: i32) -> (i32, i32, i32) {
    %c0_i32 = arith.constant 0 : i32
    %c0_i32_0 = arith.constant 0 : i32
    %c0_i32_1 = arith.constant 0 : i32
    return %arg0, %c0_i32, %c0_i32_0 : i32, i32, i32
  }
  func.func @transform_1(%arg0: i32) -> (i32, i32) {
    %c0_i32 = arith.constant 0 : i32
    %c0_i32_0 = arith.constant 0 : i32
    %c0_i32_1 = arith.constant 0 : i32
    return %c0_i32, %c0_i32_0 : i32, i32
  }
  func.func @transform_2(%arg0: i32) -> (i32, i32) {
    %c0_i32 = arith.constant 0 : i32
    %c0_i32_0 = arith.constant 0 : i32
    %c0_i32_1 = arith.constant 0 : i32
    return %c0_i32, %c0_i32_0 : i32, i32
  }
  func.func @transform_3(%arg0: i32) -> (i32, i32) {
    %c0_i32 = arith.constant 0 : i32
    %c0_i32_0 = arith.constant 0 : i32
    %c0_i32_1 = arith.constant 0 : i32
    return %c0_i32, %c0_i32_0 : i32, i32
  }
  func.func @transform_4(%arg0: i32) -> (i32, i32) {
    %c0_i32 = arith.constant 0 : i32
    %c0_i32_0 = arith.constant 0 : i32
    %c0_i32_1 = arith.constant 0 : i32
    return %c0_i32, %c0_i32_0 : i32, i32
  }
  func.func @transform_5(%arg0: i32) -> (i32, i32) {
    %c0_i32 = arith.constant 0 : i32
    %c0_i32_0 = arith.constant 0 : i32
    %c0_i32_1 = arith.constant 0 : i32
    return %c0_i32, %c0_i32_0 : i32, i32
  }
  func.func @transform_6(%arg0: i32) -> (i32, i32) {
    %c0_i32 = arith.constant 0 : i32
    %c0_i32_0 = arith.constant 0 : i32
    %c0_i32_1 = arith.constant 0 : i32
    return %c0_i32, %c0_i32_0 : i32, i32
  }
  func.func @transform_7(%arg0: i32) -> (i32, i32) {
    %c0_i32 = arith.constant 0 : i32
    %c0_i32_0 = arith.constant 0 : i32
    return %arg0, %c0_i32 : i32, i32
  }
}

</mosaic_0001>

<bundles_post_ra>
// kernel: timm_wrapper_forward.1
= control target key start
LH: loop header
LB: loop body
LE: loop exit
PB: predicated region body
PF: predicated region fallthrough
CT: control target
= control target key end

     0   :  { %s3394_s0 = inlined_call_operand.vmem [shape: bf16[2,256,128], index: 0, kind: input, shape index: {}]   ;;  %s3395_s1 = inlined_call_operand.vmem [shape: bf16[128,128], index: 1, kind: input, shape index: {}]   ;;  %s3396_s2 = inlined_call_operand.vmem [shape: f32[1,128], index: 2, kind: input, shape index: {}]   ;;  %s3397_s3 = inlined_call_operand.vmem [shape: bf16[128,1024], index: 3, kind: input, shape index: {}]   ;;  %s3398_s4 = inlined_call_operand.vmem [shape: f32[1,1024], index: 4, kind: input, shape index: {}]   ;;  %s3399_s5 = inlined_call_operand.vmem [shape: bf16[1024,128], index: 5, kind: input, shape index: {}]   ;;  %s3400_s6 = inlined_call_operand.vmem [shape: f32[1,128], index: 6, kind: input, shape index: {}]   ;;  %s3401_s7 = inlined_call_operand.hbm [shape: f32[2,128], index: 7, kind: output, shape index: {}]  }
   0x1   :  { %v2578_v0 = vld [vmem:[%s3395_s1] sm:$0xff]   ;;  %v2579_v1 = vld [vmem:[%s3395_s1 + $0x8] sm:$0xff]   ;;  %v2580_v2 = vld [vmem:[%s3395_s1 + $0x10] sm:$0xff]  }
   0x2   :  { %2480 = vmatprep.subr.bf16.mxu0 %v2578_v0  ;;  %2528 = vmatprep.subr.bf16.mxu1 %v2578_v0  ;;  %v2581_v3 = vld [vmem:[%s3395_s1 + $0x18] sm:$0xff]   ;;  %v2586_v4 = vld [vmem:[%s3394_s0] sm:$0xff]   ;;  %v2583_v7 = vld [vmem:[%s3395_s1 + $0x28] sm:$0xff]  }
   0x3   :  { %2481 = vmatpush3.bf16.msra.mxu0 %v2578_v0  ;;  %2529 = vmatpush3.bf16.msra.mxu1 %v2578_v0  ;;  %v2587_v5 = vld [vmem:[%s3394_s0 + $0x40] sm:$0xff]   ;;  %v2584_v8 = vld [vmem:[%s3395_s1 + $0x30] sm:$0xff]   ;;  %v2585_v9 = vld [vmem:[%s3395_s1 + $0x38] sm:$0xff]  }
   0x4   :  { %2482 = vmatprep.subr.bf16.mxu0 %v2579_v1  ;;  %2530 = vmatprep.subr.bf16.mxu1 %v2579_v1  ;;  %v2582_v6 = vld [vmem:[%s3395_s1 + $0x20] sm:$0xff]   ;;  %v2588_v10 = vld [vmem:[%s3394_s0 + $0x8] sm:$0xff]   ;;  %v2590_v12 = vld [vmem:[%s3394_s0 + $0x10] sm:$0xff]  }
   0x5   :  { %2496 = vmatprep.mubr.bf16.mxu0 %v2586_v4  ;;  %2544 = vmatprep.mubr.bf16.mxu1 %v2587_v5  ;;  %v2589_v11 = vld [vmem:[%s3394_s0 + $0x48] sm:$0xff]   ;;  %v2591_v13 = vld [vmem:[%s3394_s0 + $0x50] sm:$0xff]   ;;  %v2592_v14 = vld [vmem:[%s3394_s0 + $0x18] sm:$0xff]  }
   0x6   :  { %v2593_v15 = vld [vmem:[%s3394_s0 + $0x58] sm:$0xff]   ;;  %v2594_v16 = vld [vmem:[%s3394_s0 + $0x20] sm:$0xff]   ;;  %v2596_v18 = vld [vmem:[%s3394_s0 + $0x28] sm:$0xff]  }
   0x7   :  { %2483 = vmatpush3.bf16.msra.mxu0 %v2579_v1  ;;  %2531 = vmatpush3.bf16.msra.mxu1 %v2579_v1  ;;  %v2595_v17 = vld [vmem:[%s3394_s0 + $0x60] sm:$0xff]   ;;  %v2597_v19 = vld [vmem:[%s3394_s0 + $0x68] sm:$0xff]   ;;  %v2598_v20 = vld [vmem:[%s3394_s0 + $0x30] sm:$0xff]  }
   0x8   :  { %2484 = vmatprep.subr.bf16.mxu0 %v2580_v2  ;;  %2532 = vmatprep.subr.bf16.mxu1 %v2580_v2  ;;  %v2599_v21 = vld [vmem:[%s3394_s0 + $0x70] sm:$0xff]   ;;  %v2600_v22 = vld [vmem:[%s3394_s0 + $0x38] sm:$0xff]   ;;  %v2602_v24 = vld [vmem:[%s3394_s0 + $0x80] sm:$0xff]  }
   0x9   :  { %v2601_v23 = vld [vmem:[%s3394_s0 + $0x78] sm:$0xff]   ;;  %v2603_v25 = vld [vmem:[%s3394_s0 + $0xc0] sm:$0xff]   ;;  %v2604_v26 = vld [vmem:[%s3394_s0 + $0x88] sm:$0xff]  }
   0xa   :  { %v2605_v27 = vld [vmem:[%s3394_s0 + $0xc8] sm:$0xff]   ;;  %v2606_v28 = vld [vmem:[%s3394_s0 + $0x90] sm:$0xff]   ;;  %v2608_v30 = vld [vmem:[%s3394_s0 + $0x98] sm:$0xff]  }
   0xb   :  { %2485 = vmatpush3.bf16.msra.mxu0 %v2580_v2  ;;  %2533 = vmatpush3.bf16.msra.mxu1 %v2580_v2  ;;  %v2607_v29 = vld [vmem:[%s3394_s0 + $0xd0] sm:$0xff]   ;;  %v2609_v31 = vld [vmem:[%s3394_s0 + $0xd8] sm:$0xff]   ;;  %v2610_v32 = vld [vmem:[%s3394_s0 + $0xa0] sm:$0xff]  }
   0xc   :  { %2486 = vmatprep.subr.bf16.mxu0 %v2581_v3  ;;  %2534 = vmatprep.subr.bf16.mxu1 %v2581_v3  ;;  %v2611_v33 = vld [vmem:[%s3394_s0 + $0xe0] sm:$0xff]   ;;  %v2612_v34 = vld [vmem:[%s3394_s0 + $0xa8] sm:$0xff]   ;;  %v2614_v36 = vld [vmem:[%s3394_s0 + $0xb0] sm:$0xff]  }
   0xd   :  { %v2613_v35 = vld [vmem:[%s3394_s0 + $0xe8] sm:$0xff]   ;;  %v2615_v37 = vld [vmem:[%s3394_s0 + $0xf0] sm:$0xff]  }
   0xf   :  { %2487 = vmatpush3.bf16.msra.mxu0 %v2581_v3  ;;  %2535 = vmatpush3.bf16.msra.mxu1 %v2581_v3 }
  0x10   :  { %2488 = vmatprep.subr.bf16.mxu0 %v2582_v6  ;;  %2536 = vmatprep.subr.bf16.mxu1 %v2582_v6 }
  0x13   :  { %2489 = vmatpush3.bf16.msra.mxu0 %v2582_v6  ;;  %2537 = vmatpush3.bf16.msra.mxu1 %v2582_v6 }
  0x14   :  { %2490 = vmatprep.subr.bf16.mxu0 %v2583_v7  ;;  %2538 = vmatprep.subr.bf16.mxu1 %v2583_v7 }
  0x17   :  { %2491 = vmatpush3.bf16.msra.mxu0 %v2583_v7  ;;  %2539 = vmatpush3.bf16.msra.mxu1 %v2583_v7 }
  0x18   :  { %2492 = vmatprep.subr.bf16.mxu0 %v2584_v8  ;;  %2540 = vmatprep.subr.bf16.mxu1 %v2584_v8 }
  0x1b   :  { %2493 = vmatpush3.bf16.msra.mxu0 %v2584_v8  ;;  %2541 = vmatpush3.bf16.msra.mxu1 %v2584_v8 }
  0x1c   :  { %2494 = vmatprep.subr.bf16.mxu0 %v2585_v9  ;;  %2542 = vmatprep.subr.bf16.mxu1 %v2585_v9 }
  0x1f   :  { %2495 = vmatpush3.bf16.msra.mxu0 %v2585_v9  ;;  %2543 = vmatpush3.bf16.msra.mxu1 %v2585_v9 }
  0x22   :  { %2497 = vmatmul.mubr.bf16.vlgmr.msra.gmra.mrb[0].mxu0 %v2588_v10  ;;  %2545 = vmatmul.mubr.bf16.vlgmr.msra.gmra.mrb[0].mxu1 %v2589_v11 }
  0x23   :  { %2500 = vmatprep.mubr.bf16.mxu0 %v2590_v12  ;;  %2548 = vmatprep.mubr.bf16.mxu1 %v2591_v13 }
  0x2a   :  { %2501 = vmatmul.mubr.bf16.gmra.mrb[4].mxu0 %v2592_v14  ;;  %2549 = vmatmul.mubr.bf16.gmra.mrb[4].mxu1 %v2593_v15 }
  0x2b   :  { %2504 = vmatprep.mubr.bf16.mxu0 %v2594_v16  ;;  %2552 = vmatprep.mubr.bf16.mxu1 %v2595_v17 }
  0x32   :  { %2505 = vmatmul.mubr.bf16.gmra.mrb[8].mxu0 %v2596_v18  ;;  %2553 = vmatmul.mubr.bf16.gmra.mrb[8].mxu1 %v2597_v19 }
  0x33   :  { %2508 = vmatprep.mubr.bf16.mxu0 %v2598_v20  ;;  %2556 = vmatprep.mubr.bf16.mxu1 %v2599_v21 }
  0x3a   :  { %2509 = vmatmul.mubr.bf16.gmra.mrb[12].mxu0 %v2600_v22  ;;  %2557 = vmatmul.mubr.bf16.gmra.mrb[12].mxu1 %v2601_v23 }
  0x3b   :  { %2512 = vmatprep.mubr.bf16.mxu0 %v2602_v24  ;;  %2560 = vmatprep.mubr.bf16.mxu1 %v2603_v25 }
  0x42   :  { %2513 = vmatmul.mubr.bf16.gmra.mrb[16].mxu0 %v2604_v26  ;;  %2561 = vmatmul.mubr.bf16.gmra.mrb[16].mxu1 %v2605_v27 }
  0x43   :  { %2516 = vmatprep.mubr.bf16.mxu0 %v2606_v28  ;;  %2564 = vmatprep.mubr.bf16.mxu1 %v2607_v29 }
  0x4a   :  { %2517 = vmatmul.mubr.bf16.gmra.mrb[20].mxu0 %v2608_v30  ;;  %2565 = vmatmul.mubr.bf16.gmra.mrb[20].mxu1 %v2609_v31 }
  0x4b   :  { %2520 = vmatprep.mubr.bf16.mxu0 %v2610_v32  ;;  %2568 = vmatprep.mubr.bf16.mxu1 %v2611_v33 }
  0x52   :  { %2521 = vmatmul.mubr.bf16.gmra.mrb[24].mxu0 %v2612_v34  ;;  %2569 = vmatmul.mubr.bf16.gmra.mrb[24].mxu1 %v2613_v35 }
  0x53   :  { %12 = vsyncpa [#allocation3], 0  ;;  %2524 = vmatprep.mubr.bf16.mxu0 %v2614_v36  ;;  %2572 = vmatprep.mubr.bf16.mxu1 %v2615_v37  ;;  %v2616_v38 = vld [vmem:[%s3394_s0 + $0xb8] sm:$0xff]   ;;  %v834_v40 = vld [vmem:[%s3397_s3] sm:$0xff]  ;;  %vm944_vm0 = vcmask 1041409  }
  0x54   :  { %v2617_v39 = vld [vmem:[%s3394_s0 + $0xf8] sm:$0xff]   ;;  %v838_v41 = vld [vmem:[%s3397_s3 + $0x20] sm:$0xff]  ;;  %v835_v42 = vld [vmem:[%s3397_s3 + $0x8] sm:$0xff] }
  0x55   :  { %v2215_v43 = vcombine.low %v834_v40, %v838_v41  ;;  %v2216_v44 = vcombine.high %v834_v40, %v838_v41  ;;  %v839_v45 = vld [vmem:[%s3397_s3 + $0x28] sm:$0xff]  ;;  %v842_v46 = vld [vmem:[%s3397_s3 + $0x40] sm:$0xff]  ;;  %v2967_v40 = vld [vmem:[%s3397_s3 + $0x10] sm:$0xff] }
  0x56   :  { %v846_v47 = vld [vmem:[%s3397_s3 + $0x60] sm:$0xff]  ;;  %v2217_v48 = vcombine.low %v835_v42, %v839_v45  ;;  %v2218_v49 = vcombine.high %v835_v42, %v839_v45  ;;  %v843_v51 = vld [vmem:[%s3397_s3 + $0x48] sm:$0xff]  ;;  %v2972_v41 = vld [vmem:[%s3397_s3 + $0x30] sm:$0xff] }
  0x57   :  { %v2224_v50 = vcombine.high %v842_v46, %v846_v47  ;;  %v847_v52 = vld [vmem:[%s3397_s3 + $0x68] sm:$0xff]  ;;  %v850_v53 = vld [vmem:[%s3397_s3 + $0x80] sm:$0xff]  ;;  %1268 = vmatprep.subr.bf16.mxu0 %v2216_v44  ;;  %v2223_v58 = vcombine.low %v842_v46, %v846_v47  ;;  %v2977_v42 = vld [vmem:[%s3397_s3 + $0x18] sm:$0xff]  ;;  %v2219_v44 = vcombine.low %v2967_v40, %v2972_v41  ;;  %v2220_v45 = vcombine.high %v2967_v40, %v2972_v41 }
  0x58   :  { %v2226_v54 = vcombine.high %v843_v51, %v847_v52  ;;  %v854_v55 = vld [vmem:[%s3397_s3 + $0xa0] sm:$0xff]  ;;  %v851_v56 = vld [vmem:[%s3397_s3 + $0x88] sm:$0xff]  ;;  %1269 = vmatpush1.bf16.msra.mxu0 %v2215_v43  ;;  %1309 = vmatprep.subr.bf16.mxu1 %v2218_v49  ;;  %v2225_v59 = vcombine.low %v843_v51, %v847_v52  ;;  %v2706_v43 = vmov 0   ;;  %v2987_v46 = vld [vmem:[%s3397_s3 + $0x38] sm:$0xff] }
  0x59   :  { %v855_v57 = vld [vmem:[%s3397_s3 + $0xa8] sm:$0xff]  ;;  %1310 = vmatpush1.bf16.msra.mxu1 %v2217_v48  ;;  %1270 = vmatprep.subr.bf16.mxu0 %v2224_v50  ;;  %v2232_v60 = vcombine.high %v850_v53, %v854_v55  ;;  %v858_v62 = vld [vmem:[%s3397_s3 + $0xc0] sm:$0xff]  ;;  %v2231_v2 = vcombine.low %v850_v53, %v854_v55  ;;  %v2221_v47 = vcombine.low %v2977_v42, %v2987_v46  ;;  %v861_v40 = vld [vmem:[%s3397_s3 + $0xd8] sm:$0xff] }
  0x5a   :  { %2525 = vmatmul.mubr.bf16.gmra.mrb[28].mxu0 %v2616_v38  ;;  %2573 = vmatmul.mubr.bf16.gmra.mrb[28].mxu1 %v2617_v39  ;;  %v2234_v61 = vcombine.high %v851_v56, %v855_v57  ;;  %v862_v63 = vld [vmem:[%s3397_s3 + $0xe0] sm:$0xff]  ;;  %v859_v0 = vld [vmem:[%s3397_s3 + $0xc8] sm:$0xff]  ;;  %v2233_v3 = vcombine.low %v851_v56, %v855_v57  ;;  %v2222_v48 = vcombine.high %v2977_v42, %v2987_v46  ;;  %v865_v41 = vld [vmem:[%s3397_s3 + $0xf8] sm:$0xff] }
  0x5b   :  { %1311 = vmatprep.subr.bf16.mxu1 %v2226_v54  ;;  %v863_v1 = vld [vmem:[%s3397_s3 + $0xe8] sm:$0xff]  ;;  %v2240_v4 = vcombine.high %v858_v62, %v862_v63  ;;  %v2239_v6 = vcombine.low %v858_v62, %v862_v63  ;;  %v866_v8 = vld [vmem:[%s3397_s3 + $0x100] sm:$0xff]  ;;  %1300 = vmatprep.mubr.bf16.mxu0 %v2706_v43 }
  0x5c   :  { %1271 = vmatpush1.bf16.msra.mxu0 %v2223_v58  ;;  %v2242_v5 = vcombine.high %v859_v0, %v863_v1  ;;  %v2241_v7 = vcombine.low %v859_v0, %v863_v1  ;;  %v870_v9 = vld [vmem:[%s3397_s3 + $0x120] sm:$0xff]  ;;  %v867_v10 = vld [vmem:[%s3397_s3 + $0x108] sm:$0xff]  ;;  %1341 = vmatprep.mubr.bf16.mxu1 %v2706_v43 }
  0x5d   :  { %1312 = vmatpush1.bf16.msra.mxu1 %v2225_v59  ;;  %1272 = vmatprep.subr.bf16.mxu0 %v2232_v60  ;;  %v2248_v11 = vcombine.high %v866_v8, %v870_v9  ;;  %v871_v12 = vld [vmem:[%s3397_s3 + $0x128] sm:$0xff]  ;;  %v2247_v13 = vcombine.low %v866_v8, %v870_v9  ;;  %v874_v16 = vld [vmem:[%s3397_s3 + $0x140] sm:$0xff] }
  0x5e   :  { %1313 = vmatprep.subr.bf16.mxu1 %v2234_v61  ;;  %v2249_v14 = vcombine.low %v867_v10, %v871_v12  ;;  %v2250_v15 = vcombine.high %v867_v10, %v871_v12  ;;  %v878_v17 = vld [vmem:[%s3397_s3 + $0x160] sm:$0xff]  ;;  %v875_v18 = vld [vmem:[%s3397_s3 + $0x148] sm:$0xff] }
  0x5f   :  { %v2256_v19 = vcombine.high %v874_v16, %v878_v17  ;;  %v879_v20 = vld [vmem:[%s3397_s3 + $0x168] sm:$0xff]  ;;  %v2255_v21 = vcombine.low %v874_v16, %v878_v17  ;;  %v882_v24 = vld [vmem:[%s3397_s3 + $0x180] sm:$0xff] }
  0x60   :  { %1273 = vmatpush1.bf16.msra.mxu0 %v2231_v2  ;;  %v2257_v22 = vcombine.low %v875_v18, %v879_v20  ;;  %v2258_v23 = vcombine.high %v875_v18, %v879_v20  ;;  %v886_v25 = vld [vmem:[%s3397_s3 + $0x1a0] sm:$0xff]  ;;  %v883_v26 = vld [vmem:[%s3397_s3 + $0x188] sm:$0xff] }
  0x61   :  { %1314 = vmatpush1.bf16.msra.mxu1 %v2233_v3  ;;  %1274 = vmatprep.subr.bf16.mxu0 %v2240_v4  ;;  %v2264_v27 = vcombine.high %v882_v24, %v886_v25  ;;  %v887_v28 = vld [vmem:[%s3397_s3 + $0x1a8] sm:$0xff]  ;;  %v2263_v29 = vcombine.low %v882_v24, %v886_v25  ;;  %v890_v32 = vld [vmem:[%s3397_s3 + $0x1c0] sm:$0xff] }
  0x62   :  { %1315 = vmatprep.subr.bf16.mxu1 %v2242_v5  ;;  %v2265_v30 = vcombine.low %v883_v26, %v887_v28  ;;  %v2266_v31 = vcombine.high %v883_v26, %v887_v28  ;;  %v894_v33 = vld [vmem:[%s3397_s3 + $0x1e0] sm:$0xff]  ;;  %v891_v34 = vld [vmem:[%s3397_s3 + $0x1c8] sm:$0xff] }
  0x63   :  { %v2272_v35 = vcombine.high %v890_v32, %v894_v33  ;;  %v895_v36 = vld [vmem:[%s3397_s3 + $0x1e8] sm:$0xff]  ;;  %v2271_v37 = vcombine.low %v890_v32, %v894_v33  ;;  %v2997_v49 = vld [vmem:[%s3396_s2] ss:$0 sm:$0xff] }
  0x64   :  { %1275 = vmatpush1.bf16.msra.mxu0 %v2239_v6  ;;  %v2273_v38 = vcombine.low %v891_v34, %v895_v36  ;;  %v2274_v39 = vcombine.high %v891_v34, %v895_v36 }
  0x65   :  { %1316 = vmatpush1.bf16.msra.mxu1 %v2241_v7  ;;  %1276 = vmatprep.subr.bf16.mxu0 %v2248_v11 }
  0x66   :  { %1317 = vmatprep.subr.bf16.mxu1 %v2250_v15 }
  0x68   :  { %1277 = vmatpush1.bf16.msra.mxu0 %v2247_v13 }
  0x69   :  { %1318 = vmatpush1.bf16.msra.mxu1 %v2249_v14  ;;  %1278 = vmatprep.subr.bf16.mxu0 %v2256_v19 }
  0x6a   :  { %1319 = vmatprep.subr.bf16.mxu1 %v2258_v23 }
  0x6c   :  { %1279 = vmatpush1.bf16.msra.mxu0 %v2255_v21 }
  0x6d   :  { %1320 = vmatpush1.bf16.msra.mxu1 %v2257_v22  ;;  %1280 = vmatprep.subr.bf16.mxu0 %v2264_v27 }
  0x6e   :  { %1321 = vmatprep.subr.bf16.mxu1 %v2266_v31 }
  0x70   :  { %1281 = vmatpush1.bf16.msra.mxu0 %v2263_v29 }
  0x71   :  { %1322 = vmatpush1.bf16.msra.mxu1 %v2265_v30  ;;  %1282 = vmatprep.subr.bf16.mxu0 %v2272_v35 }
  0x72   :  { %1323 = vmatprep.subr.bf16.mxu1 %v2274_v39 }
  0x74   :  { %1283 = vmatpush1.bf16.msra.mxu0 %v2271_v37 }
  0x75   :  { %1324 = vmatpush1.bf16.msra.mxu1 %v2273_v38  ;;  %1350 = vmatprep.subr.bf16.mxu0 %v2220_v45 }
  0x76   :  { %1391 = vmatprep.subr.bf16.mxu1 %v2222_v48 }
  0xf5   :  { %v2498_v50 = vpop.f32.mrb[0].mxu0  ;;  %v2546_v51 = vpop.f32.mrb[0].mxu1 }
  0xf6   :  { %v261_v52 = vpop.f32.mrb[1].mxu0  ;;  %v627_v53 = vpop.f32.mrb[1].mxu1  ;;  %v270_v60 = vadd.f32 %v2498_v50, %v2997_v49  ;;  %v636_v61 = vadd.f32 %v2546_v51, %v2997_v49 }
  0xf7   :  { %v262_v54 = vadd.f32 %v2997_v49, %v261_v52  ;;  %v628_v55 = vadd.f32 %v2997_v49, %v627_v53  ;;  %v2499_v56 = vpop.f32.mrb[2].mxu0  ;;  %v2547_v57 = vpop.f32.mrb[2].mxu1 }
  0xf8   :  { %v264_v58 = vpop.f32.mrb[3].mxu0  ;;  %v630_v59 = vpop.f32.mrb[3].mxu1  ;;  %v273_v0 = vadd.f32 %v2499_v56, %v2997_v49  ;;  %v639_v1 = vadd.f32 %v2547_v57, %v2997_v49  ;;  %v390_v6 = vmax.f32 %v270_v60, 0.0  ;;  %v756_v7 = vmax.f32 %v636_v61, 0.0 }
  0xf9   :  { %v265_v62 = vadd.f32 %v2997_v49, %v264_v58  ;;  %v631_v63 = vadd.f32 %v2997_v49, %v630_v59  ;;  %v388_v2 = vmax.f32 %v262_v54, 0.0  ;;  %v754_v3 = vmax.f32 %v628_v55, 0.0 }
  0xfa   :  { %v391_v12 = vmax.f32 %v273_v0, 0.0  ;;  %v757_v13 = vmax.f32 %v639_v1, 0.0 }
  0xfb   :  { %v389_v4 = vmax.f32 %v265_v62, 0.0  ;;  %v755_v5 = vmax.f32 %v631_v63, 0.0 }
  0xfd   :  { %v420_v8 = vadd.f32 %v389_v4, %v388_v2  ;;  %v786_v9 = vadd.f32 %v755_v5, %v754_v3  ;;  %v2502_v10 = vpop.f32.mrb[4].mxu0  ;;  %v2550_v11 = vpop.f32.mrb[4].mxu1 }
  0xfe   :  { %v277_v14 = vpop.f32.mrb[5].mxu0  ;;  %v643_v15 = vpop.f32.mrb[5].mxu1  ;;  %v286_v28 = vadd.f32 %v2502_v10, %v2997_v49  ;;  %v652_v29 = vadd.f32 %v2550_v11, %v2997_v49 }
  0xff   :  { %v421_v16 = vadd.f32 %v420_v8, %v390_v6  ;;  %v787_v17 = vadd.f32 %v786_v9, %v756_v7  ;;  %v278_v18 = vadd.f32 %v2997_v49, %v277_v14  ;;  %v644_v19 = vadd.f32 %v2997_v49, %v643_v15  ;;  %v2503_v20 = vpop.f32.mrb[6].mxu0  ;;  %v2551_v21 = vpop.f32.mrb[6].mxu1 }
 0x100   :  { %v280_v22 = vpop.f32.mrb[7].mxu0  ;;  %v646_v23 = vpop.f32.mrb[7].mxu1  ;;  %v289_v34 = vadd.f32 %v2503_v20, %v2997_v49  ;;  %v655_v35 = vadd.f32 %v2551_v21, %v2997_v49  ;;  %v394_v45 = vmax.f32 %v286_v28, 0.0  ;;  %v760_v48 = vmax.f32 %v652_v29, 0.0 }
 0x101   :  { %v392_v24 = vmax.f32 %v278_v18, 0.0  ;;  %v422_v25 = vadd.f32 %v421_v16, %v391_v12  ;;  %v758_v26 = vmax.f32 %v644_v19, 0.0  ;;  %v788_v27 = vadd.f32 %v787_v17, %v757_v13 }
 0x102   :  { %v281_v30 = vadd.f32 %v2997_v49, %v280_v22  ;;  %v647_v31 = vadd.f32 %v2997_v49, %v646_v23  ;;  %v395_v58 = vmax.f32 %v289_v34, 0.0  ;;  %v761_v59 = vmax.f32 %v655_v35, 0.0 }
 0x103   :  { %v423_v32 = vadd.f32 %v422_v25, %v392_v24  ;;  %v789_v33 = vadd.f32 %v788_v27, %v758_v26 }
 0x104   :  { %v393_v36 = vmax.f32 %v281_v30, 0.0  ;;  %v759_v37 = vmax.f32 %v647_v31, 0.0 }
 0x105   :  { %v2506_v38 = vpop.f32.mrb[8].mxu0  ;;  %v2554_v39 = vpop.f32.mrb[8].mxu1 }
 0x106   :  { %v424_v50 = vadd.f32 %v423_v32, %v393_v36  ;;  %v790_v51 = vadd.f32 %v789_v33, %v759_v37  ;;  %v293_v52 = vpop.f32.mrb[9].mxu0  ;;  %v659_v53 = vpop.f32.mrb[9].mxu1  ;;  %v302_v0 = vadd.f32 %v2506_v38, %v2997_v49  ;;  %v668_v1 = vadd.f32 %v2554_v39, %v2997_v49 }
 0x107   :  { %v294_v54 = vadd.f32 %v2997_v49, %v293_v52  ;;  %v660_v55 = vadd.f32 %v2997_v49, %v659_v53  ;;  %v2507_v56 = vpop.f32.mrb[10].mxu0  ;;  %v2555_v57 = vpop.f32.mrb[10].mxu1 }
 0x108   :  { %v425_v60 = vadd.f32 %v424_v50, %v394_v45  ;;  %v791_v61 = vadd.f32 %v790_v51, %v760_v48  ;;  %v296_v62 = vpop.f32.mrb[11].mxu0  ;;  %v662_v63 = vpop.f32.mrb[11].mxu1  ;;  %v305_v8 = vadd.f32 %v2507_v56, %v2997_v49  ;;  %v671_v9 = vadd.f32 %v2555_v57, %v2997_v49 }
 0x109   :  { %v396_v2 = vmax.f32 %v294_v54, 0.0  ;;  %v762_v3 = vmax.f32 %v660_v55, 0.0  ;;  %v297_v6 = vadd.f32 %v2997_v49, %v296_v62  ;;  %v663_v7 = vadd.f32 %v2997_v49, %v662_v63 }
 0x10a   :  { %v426_v4 = vadd.f32 %v425_v60, %v395_v58  ;;  %v792_v5 = vadd.f32 %v791_v61, %v761_v59  ;;  %v398_v16 = vmax.f32 %v302_v0, 0.0  ;;  %v764_v17 = vmax.f32 %v668_v1, 0.0 }
 0x10b   :  { %v397_v12 = vmax.f32 %v297_v6, 0.0  ;;  %v763_v13 = vmax.f32 %v663_v7, 0.0  ;;  %v399_v26 = vmax.f32 %v305_v8, 0.0  ;;  %v765_v27 = vmax.f32 %v671_v9, 0.0 }
 0x10c   :  { %v427_v10 = vadd.f32 %v426_v4, %v396_v2  ;;  %v793_v11 = vadd.f32 %v792_v5, %v762_v3 }
 0x10d   :  { %v2510_v14 = vpop.f32.mrb[12].mxu0  ;;  %v2558_v15 = vpop.f32.mrb[12].mxu1 }
 0x10e   :  { %v428_v18 = vadd.f32 %v427_v10, %v397_v12  ;;  %v794_v19 = vadd.f32 %v793_v11, %v763_v13  ;;  %v309_v20 = vpop.f32.mrb[13].mxu0  ;;  %v675_v21 = vpop.f32.mrb[13].mxu1  ;;  %v318_v32 = vadd.f32 %v2510_v14, %v2997_v49  ;;  %v684_v33 = vadd.f32 %v2558_v15, %v2997_v49 }
 0x10f   :  { %v310_v22 = vadd.f32 %v2997_v49, %v309_v20  ;;  %v676_v23 = vadd.f32 %v2997_v49, %v675_v21  ;;  %v2511_v24 = vpop.f32.mrb[14].mxu0  ;;  %v2559_v25 = vpop.f32.mrb[14].mxu1 }
 0x110   :  { %v429_v28 = vadd.f32 %v428_v18, %v398_v16  ;;  %v795_v29 = vadd.f32 %v794_v19, %v764_v17  ;;  %v312_v30 = vpop.f32.mrb[15].mxu0  ;;  %v678_v31 = vpop.f32.mrb[15].mxu1  ;;  %v321_v45 = vadd.f32 %v2511_v24, %v2997_v49  ;;  %v687_v48 = vadd.f32 %v2559_v25, %v2997_v49 }
 0x111   :  { %v400_v34 = vmax.f32 %v310_v22, 0.0  ;;  %v766_v35 = vmax.f32 %v676_v23, 0.0  ;;  %v313_v38 = vadd.f32 %v2997_v49, %v312_v30  ;;  %v679_v39 = vadd.f32 %v2997_v49, %v678_v31 }
 0x112   :  { %v430_v36 = vadd.f32 %v429_v28, %v399_v26  ;;  %v796_v37 = vadd.f32 %v795_v29, %v765_v27  ;;  %v402_v56 = vmax.f32 %v318_v32, 0.0  ;;  %v768_v57 = vmax.f32 %v684_v33, 0.0 }
 0x113   :  { %v401_v52 = vmax.f32 %v313_v38, 0.0  ;;  %v767_v53 = vmax.f32 %v679_v39, 0.0  ;;  %v403_v2 = vmax.f32 %v321_v45, 0.0  ;;  %v769_v3 = vmax.f32 %v687_v48, 0.0 }
 0x114   :  { %v431_v50 = vadd.f32 %v430_v36, %v400_v34  ;;  %v797_v51 = vadd.f32 %v796_v37, %v766_v35 }
 0x115   :  { %v2514_v54 = vpop.f32.mrb[16].mxu0  ;;  %v2562_v55 = vpop.f32.mrb[16].mxu1 }
 0x116   :  { %v432_v58 = vadd.f32 %v431_v50, %v401_v52  ;;  %v798_v59 = vadd.f32 %v797_v51, %v767_v53  ;;  %v325_v60 = vpop.f32.mrb[17].mxu0  ;;  %v691_v61 = vpop.f32.mrb[17].mxu1  ;;  %v334_v8 = vadd.f32 %v2514_v54, %v2997_v49  ;;  %v700_v9 = vadd.f32 %v2562_v55, %v2997_v49 }
 0x117   :  { %v326_v62 = vadd.f32 %v2997_v49, %v325_v60  ;;  %v692_v63 = vadd.f32 %v2997_v49, %v691_v61  ;;  %v2515_v0 = vpop.f32.mrb[18].mxu0  ;;  %v2563_v1 = vpop.f32.mrb[18].mxu1 }
 0x118   :  { %v433_v4 = vadd.f32 %v432_v58, %v402_v56  ;;  %v799_v5 = vadd.f32 %v798_v59, %v768_v57  ;;  %v328_v6 = vpop.f32.mrb[19].mxu0  ;;  %v694_v7 = vpop.f32.mrb[19].mxu1  ;;  %v337_v16 = vadd.f32 %v2515_v0, %v2997_v49  ;;  %v703_v17 = vadd.f32 %v2563_v1, %v2997_v49 }
 0x119   :  { %v329_v12 = vadd.f32 %v2997_v49, %v328_v6  ;;  %v695_v13 = vadd.f32 %v2997_v49, %v694_v7  ;;  %v404_v14 = vmax.f32 %v326_v62, 0.0  ;;  %v770_v15 = vmax.f32 %v692_v63, 0.0 }
 0x11a   :  { %v434_v10 = vadd.f32 %v433_v4, %v403_v2  ;;  %v800_v11 = vadd.f32 %v799_v5, %v769_v3  ;;  %v406_v22 = vmax.f32 %v334_v8, 0.0  ;;  %v772_v23 = vmax.f32 %v700_v9, 0.0 }
 0x11b   :  { %v405_v20 = vmax.f32 %v329_v12, 0.0  ;;  %v771_v21 = vmax.f32 %v695_v13, 0.0  ;;  %v407_v32 = vmax.f32 %v337_v16, 0.0  ;;  %v773_v33 = vmax.f32 %v703_v17, 0.0 }
 0x11c   :  { %v435_v18 = vrot.slane %v434_v10, 4  ;;  %v801_v19 = vrot.slane %v800_v11, 4 }
 0x11d   :  { %v2518_v24 = vpop.f32.mrb[20].mxu0  ;;  %v2566_v25 = vpop.f32.mrb[20].mxu1  ;;  %v441_v28 = vadd.f32 %v405_v20, %v404_v14  ;;  %v807_v29 = vadd.f32 %v771_v21, %v770_v15 }
 0x11e   :  { %v436_v26 = vadd.f32 %v435_v18, %v434_v10  ;;  %v802_v27 = vadd.f32 %v801_v19, %v800_v11  ;;  %v341_v30 = vpop.f32.mrb[21].mxu0  ;;  %v707_v31 = vpop.f32.mrb[21].mxu1  ;;  %v350_v52 = vadd.f32 %v2518_v24, %v2997_v49  ;;  %v716_v53 = vadd.f32 %v2566_v25, %v2997_v49 }
 0x11f   :  { %v342_v34 = vadd.f32 %v2997_v49, %v341_v30  ;;  %v708_v35 = vadd.f32 %v2997_v49, %v707_v31  ;;  %v2519_v36 = vpop.f32.mrb[22].mxu0  ;;  %v2567_v37 = vpop.f32.mrb[22].mxu1  ;;  %v442_v45 = vadd.f32 %v441_v28, %v406_v22  ;;  %v808_v48 = vadd.f32 %v807_v29, %v772_v23 }
 0x120   :  { %v437_v38 = vrot.slane %v436_v26, 2  ;;  %v803_v39 = vrot.slane %v802_v27, 2  ;;  %v344_v50 = vpop.f32.mrb[23].mxu0  ;;  %v710_v51 = vpop.f32.mrb[23].mxu1  ;;  %v353_v60 = vadd.f32 %v2519_v36, %v2997_v49  ;;  %v719_v61 = vadd.f32 %v2567_v37, %v2997_v49 }
 0x121   :  { %v408_v54 = vmax.f32 %v342_v34, 0.0  ;;  %v774_v55 = vmax.f32 %v708_v35, 0.0  ;;  %v443_v58 = vadd.f32 %v442_v45, %v407_v32  ;;  %v809_v59 = vadd.f32 %v808_v48, %v773_v33 }
 0x122   :  { %v438_v56 = vadd.f32 %v437_v38, %v436_v26  ;;  %v804_v57 = vadd.f32 %v803_v39, %v802_v27  ;;  %v345_v62 = vadd.f32 %v2997_v49, %v344_v50  ;;  %v711_v63 = vadd.f32 %v2997_v49, %v710_v51 }
 0x123   :  { %v444_v2 = vadd.f32 %v443_v58, %v408_v54  ;;  %v810_v3 = vadd.f32 %v809_v59, %v774_v55  ;;  %v410_v10 = vmax.f32 %v350_v52, 0.0  ;;  %v776_v11 = vmax.f32 %v716_v53, 0.0 }
 0x124   :  { %v439_v0 = vrot.slane %v438_v56, 1  ;;  %v805_v1 = vrot.slane %v804_v57, 1  ;;  %v409_v4 = vmax.f32 %v345_v62, 0.0  ;;  %v775_v5 = vmax.f32 %v711_v63, 0.0 }
 0x125   :  { %v2522_v6 = vpop.f32.mrb[24].mxu0  ;;  %v2570_v7 = vpop.f32.mrb[24].mxu1  ;;  %v411_v21 = vmax.f32 %v353_v60, 0.0  ;;  %v777_v22 = vmax.f32 %v719_v61, 0.0 }
 0x126   :  { %v440_v8 = vadd.f32 %v439_v0, %v438_v56  ;;  %v806_v9 = vadd.f32 %v805_v1, %v804_v57  ;;  %v357_v12 = vpop.f32.mrb[25].mxu0  ;;  %v723_v13 = vpop.f32.mrb[25].mxu1  ;;  %v445_v14 = vadd.f32 %v444_v2, %v409_v4  ;;  %v811_v15 = vadd.f32 %v810_v3, %v775_v5 }
 0x127   :  { %v358_v16 = vadd.f32 %v2997_v49, %v357_v12  ;;  %v724_v17 = vadd.f32 %v2997_v49, %v723_v13  ;;  %v2523_v18 = vpop.f32.mrb[26].mxu0  ;;  %v2571_v19 = vpop.f32.mrb[26].mxu1  ;;  %v366_v29 = vadd.f32 %v2522_v6, %v2997_v49  ;;  %v732_v30 = vadd.f32 %v2570_v7, %v2997_v49 }
 0x128   :  { %v3049_v20 = vadd.f32 %v806_v9, %v440_v8  ;;  %v360_v23 = vpop.f32.mrb[27].mxu0  ;;  %v726_v24 = vpop.f32.mrb[27].mxu1  ;;  %v446_v25 = vadd.f32 %v445_v14, %v410_v10  ;;  %v812_v26 = vadd.f32 %v811_v15, %v776_v11  ;;  %v369_v35 = vadd.f32 %v2523_v18, %v2997_v49 }
 0x129   :  { %v412_v27 = vmax.f32 %v358_v16, 0.0  ;;  %v778_v28 = vmax.f32 %v724_v17, 0.0  ;;  %v361_v31 = vadd.f32 %v2997_v49, %v360_v23  ;;  %v727_v34 = vadd.f32 %v2997_v49, %v726_v24 }
 0x12a   :  { %v447_v32 = vadd.f32 %v446_v25, %v411_v21  ;;  %v813_v33 = vadd.f32 %v812_v26, %v777_v22  ;;  %v735_v36 = vadd.f32 %v2571_v19, %v2997_v49  ;;  %v414_v51 = vmax.f32 %v366_v29, 0.0 }
 0x12b   :  { %v413_v37 = vmax.f32 %v361_v31, 0.0  ;;  %v779_v45 = vmax.f32 %v727_v34, 0.0  ;;  %v780_v52 = vmax.f32 %v732_v30, 0.0  ;;  %v415_v61 = vmax.f32 %v369_v35, 0.0 }
 0x12c   :  { %v448_v38 = vadd.f32 %v447_v32, %v412_v27  ;;  %v814_v39 = vadd.f32 %v813_v33, %v778_v28  ;;  %v781_v62 = vmax.f32 %v735_v36, 0.0 }
 0x12d   :  { %v2526_v48 = vpop.f32.mrb[28].mxu0  ;;  %v2574_v50 = vpop.f32.mrb[28].mxu1 }
 0x12e   :  { %v373_v53 = vpop.f32.mrb[29].mxu0  ;;  %v739_v54 = vpop.f32.mrb[29].mxu1  ;;  %v449_v55 = vadd.f32 %v448_v38, %v413_v37  ;;  %v815_v56 = vadd.f32 %v814_v39, %v779_v45  ;;  %v382_v7 = vadd.f32 %v2526_v48, %v2997_v49  ;;  %v748_v8 = vadd.f32 %v2574_v50, %v2997_v49 }
 0x12f   :  { %v374_v57 = vadd.f32 %v2997_v49, %v373_v53  ;;  %v740_v58 = vadd.f32 %v2997_v49, %v739_v54  ;;  %v2527_v59 = vpop.f32.mrb[30].mxu0  ;;  %v2575_v60 = vpop.f32.mrb[30].mxu1  ;;  %v830_v37 = vmul.f32 0.00390625, %v3049_v20  ;;  %v845_v20 = vld [vmem:[%s3397_s3 + $0x58] sm:$0xff] }
 0x130   :  { %v376_v63 = vpop.f32.mrb[31].mxu0  ;;  %v742_v0 = vpop.f32.mrb[31].mxu1  ;;  %v450_v1 = vadd.f32 %v449_v55, %v414_v51  ;;  %v816_v2 = vadd.f32 %v815_v56, %v780_v52  ;;  %v385_v15 = vadd.f32 %v2527_v59, %v2997_v49  ;;  %v751_v16 = vadd.f32 %v2575_v60, %v2997_v49  ;;  %v844_v52 = vld [vmem:[%s3397_s3 + $0x50] sm:$0xff]  ;;  %v849_v56 = vld [vmem:[%s3397_s3 + $0x78] sm:$0xff] }
 0x131   :  { %v416_v3 = vmax.f32 %v374_v57, 0.0  ;;  %v782_v4 = vmax.f32 %v740_v58, 0.0  ;;  %v377_v5 = vadd.f32 %v2997_v49, %v376_v63  ;;  %v743_v6 = vadd.f32 %v2997_v49, %v742_v0  ;;  %v848_v55 = vld [vmem:[%s3397_s3 + $0x70] sm:$0xff]  ;;  %v853_v63 = vld [vmem:[%s3397_s3 + $0x98] sm:$0xff] }
 0x132   :  { %v451_v9 = vadd.f32 %v450_v1, %v415_v61  ;;  %v817_v10 = vadd.f32 %v816_v2, %v781_v62  ;;  %v418_v17 = vmax.f32 %v382_v7, 0.0  ;;  %v784_v18 = vmax.f32 %v748_v8, 0.0  ;;  %v852_v61 = vld [vmem:[%s3397_s3 + $0x90] sm:$0xff]  ;;  %v857_v0 = vld [vmem:[%s3397_s3 + $0xb8] sm:$0xff] }
 0x133   :  { %v417_v11 = vmax.f32 %v377_v5, 0.0  ;;  %v783_v12 = vmax.f32 %v743_v6, 0.0  ;;  %v419_v22 = vmax.f32 %v385_v15, 0.0  ;;  %v785_v23 = vmax.f32 %v751_v16, 0.0  ;;  %v856_v62 = vld [vmem:[%s3397_s3 + $0xb0] sm:$0xff]  ;;  %v877_v16 = vld [vmem:[%s3397_s3 + $0x158] sm:$0xff] }
 0x134   :  { %v452_v13 = vadd.f32 %v451_v9, %v416_v3  ;;  %v818_v14 = vadd.f32 %v817_v10, %v782_v4  ;;  %v832_v48 = vpack.c.bf16 %v830_v37, %v830_v37  ;;  %v2228_v59 = vcombine.high %v844_v52, %v848_v55  ;;  %v860_v5 = vld [vmem:[%s3397_s3 + $0xd0] sm:$0xff]  ;;  %v873_v9 = vld [vmem:[%s3397_s3 + $0x138] sm:$0xff] }
 0x135   :  { %v2230_v60 = vcombine.high %v845_v20, %v849_v56  ;;  %v2227_v1 = vcombine.low %v844_v52, %v848_v55  ;;  %v2229_v2 = vcombine.low %v845_v20, %v849_v56  ;;  %v2236_v3 = vcombine.high %v852_v61, %v856_v62  ;;  %v864_v6 = vld [vmem:[%s3397_s3 + $0xf0] sm:$0xff]  ;;  %v2622_v52 = vld [vmem:[%s3399_s5 + $0x48] sm:$0xff]  }
 0x136   :  { %v453_v19 = vadd.f32 %v452_v13, %v417_v11  ;;  %v819_v21 = vadd.f32 %v818_v14, %v783_v12  ;;  %v942_v53 = vunpack.c.l.b16 %v832_v48  ;;  %v2238_v4 = vcombine.high %v853_v63, %v857_v0  ;;  %v868_v7 = vld [vmem:[%s3397_s3 + $0x110] sm:$0xff]  ;;  %v2619_v48 = vld [vmem:[%s3399_s5 + $0xc0] sm:$0xff]   ;;  %v2625_v55 = vld [vmem:[%s3399_s5 + $0x88] sm:$0xff]  }
 0x137   :  { %v2235_v42 = vcombine.low %v852_v61, %v856_v62  ;;  %v2244_v46 = vcombine.high %v860_v5, %v864_v6  ;;  %v872_v8 = vld [vmem:[%s3397_s3 + $0x130] sm:$0xff]  ;;  %v2243_v10 = vcombine.low %v860_v5, %v864_v6  ;;  %v2245_v11 = vcombine.low %v861_v40, %v865_v41  ;;  %v2632_v61 = vld [vmem:[%s3399_s5 + $0x18] sm:$0xff]   ;;  %v2640_v5 = vld [vmem:[%s3399_s5 + $0x28] sm:$0xff]  }
 0x138   :  { %v454_v24 = vadd.f32 %v453_v19, %v418_v17  ;;  %v820_v25 = vadd.f32 %v819_v21, %v784_v18  ;;  %v2252_v12 = vcombine.high %v868_v7, %v872_v8  ;;  %v876_v14 = vld [vmem:[%s3397_s3 + $0x150] sm:$0xff]  ;;  %v881_v17 = vld [vmem:[%s3397_s3 + $0x178] sm:$0xff]  ;;  %v2251_v18 = vcombine.low %v868_v7, %v872_v8  ;;  %v2641_v6 = vld [vmem:[%s3399_s5 + $0xa8] sm:$0xff]  }
 0x139   :  { %v880_v15 = vld [vmem:[%s3397_s3 + $0x170] sm:$0xff]  ;;  %v2633_v62 = vld [vmem:[%s3399_s5 + $0x98] sm:$0xff]  }
 0x13a   :  { %v455_v26 = vadd.f32 %v454_v24, %v419_v22  ;;  %v821_v27 = vadd.f32 %v820_v25, %v785_v23  ;;  %v2260_v21 = vcombine.high %v876_v14, %v880_v15  ;;  %v2262_v22 = vcombine.high %v877_v16, %v881_v17  ;;  %v884_v23 = vld [vmem:[%s3397_s3 + $0x190] sm:$0xff]  ;;  %v885_v25 = vld [vmem:[%s3397_s3 + $0x198] sm:$0xff] }
 0x13b   :  { %v888_v24 = vld [vmem:[%s3397_s3 + $0x1b0] sm:$0xff]  ;;  %v2648_v7 = vld [vmem:[%s3399_s5 + $0x38] sm:$0xff]  }
 0x13c   :  { %v456_v28 = vrot.slane %v455_v26, 4  ;;  %v822_v29 = vrot.slane %v821_v27, 4  ;;  %v2626_v20 = vld [vmem:[%s3399_s5 + $0x50] sm:$0xff]   ;;  %v2649_v8 = vld [vmem:[%s3399_s5 + $0xb8] sm:$0xff]  }
 0x13d   :  { %v2627_v56 = vld [vmem:[%s3399_s5 + $0xd0] sm:$0xff]  }
 0x13e   :  { %v457_v30 = vadd.f32 %v456_v28, %v455_v26  ;;  %v823_v31 = vadd.f32 %v822_v29, %v821_v27  ;;  %v889_v26 = vld [vmem:[%s3397_s3 + $0x1b8] sm:$0xff]  ;;  %v2259_v27 = vcombine.low %v876_v14, %v880_v15  ;;  %v2261_v28 = vcombine.low %v877_v16, %v881_v17  ;;  %v3273_v14 = vld [vmem:[%s3398_s4] sm:$0xff] }
 0x13f   :  { %v2268_v29 = vcombine.high %v884_v23, %v888_v24 }
 0x140   :  { %v458_v32 = vrot.slane %v457_v30, 2  ;;  %v824_v33 = vrot.slane %v823_v31, 2 }
 0x142   :  { %v459_v34 = vadd.f32 %v458_v32, %v457_v30  ;;  %v825_v35 = vadd.f32 %v824_v33, %v823_v31  ;;  %v2270_v30 = vcombine.high %v885_v25, %v889_v26  ;;  %v892_v31 = vld [vmem:[%s3397_s3 + $0x1d0] sm:$0xff]  ;;  %v893_v33 = vld [vmem:[%s3397_s3 + $0x1d8] sm:$0xff] }
 0x143   :  { %v896_v32 = vld [vmem:[%s3397_s3 + $0x1f0] sm:$0xff] }
 0x144   :  { %v460_v36 = vrot.slane %v459_v34, 1  ;;  %v826_v49 = vrot.slane %v825_v35, 1 }
 0x146   :  { %v461_v38 = vadd.f32 %v460_v36, %v459_v34  ;;  %v827_v39 = vadd.f32 %v826_v49, %v825_v35  ;;  %v897_v34 = vld [vmem:[%s3397_s3 + $0x1f8] sm:$0xff]  ;;  %v2267_v35 = vcombine.low %v884_v23, %v888_v24  ;;  %v2269_v36 = vcombine.low %v885_v25, %v889_v26 }
 0x147   :  { %v2276_v49 = vcombine.high %v892_v31, %v896_v32  ;;  %v2278_v37 = vcombine.high %v893_v33, %v897_v34 }
 0x148   :  { %v829_v45 = vadd.f32 %v827_v39, %v461_v38  ;;  %v2275_v38 = vcombine.low %v892_v31, %v896_v32  ;;  %v2277_v39 = vcombine.low %v893_v33, %v897_v34 }
 0x14a   :  { %v831_v50 = vmul.f32 0.00390625, %v829_v45  ;;  %v2618_v45 = vld [vmem:[%s3399_s5 + $0x40] sm:$0xff]  }
 0x14c   :  { %v833_v51 = vpack.c.bf16 %v831_v50, %v831_v50  ;;  %v2620_v50 = vld [vmem:[%s3399_s5] sm:$0xff]  }
 0x14e   :  { %v943_v54 = vunpack.c.l.b16 %v833_v51  ;;  %v2621_v51 = vld [vmem:[%s3399_s5 + $0x80] sm:$0xff]  }
 0x150   :  { %v945_v57 = vsel %vm944_vm0, %v943_v54, %v942_v53  ;;  %v2623_v53 = vld [vmem:[%s3399_s5 + $0xc8] sm:$0xff]  }
 0x151   :  { %v3078_v58 = vpack.c.b16 %v945_v57, %v945_v57  ;;  %v2624_v54 = vld [vmem:[%s3399_s5 + $0x8] sm:$0xff]   ;;  %v2628_v57 = vld [vmem:[%s3399_s5 + $0x10] sm:$0xff]  }
 0x153   :  { %1301 = vmatmul.mubr.bf16.vlgmr.msra.gmra.mrb[32].mxu0 %v3078_v58  ;;  %1342 = vmatmul.mubr.bf16.vlgmr.msra.gmra.mrb[32].mxu1 %v3078_v58 }
 0x154   :  { %1351 = vmatpush1.bf16.msra.mxu0 %v2219_v44  ;;  %1392 = vmatpush1.bf16.msra.mxu1 %v2221_v47  ;;  %v2237_v44 = vcombine.low %v853_v63, %v857_v0  ;;  %v2246_v47 = vcombine.high %v861_v40, %v865_v41  ;;  %v2634_v63 = vld [vmem:[%s3399_s5 + $0x60] sm:$0xff]   ;;  %v2642_v40 = vld [vmem:[%s3399_s5 + $0x70] sm:$0xff]  }
 0x155   :  { %1352 = vmatprep.subr.bf16.mxu0 %v2228_v59  ;;  %1393 = vmatprep.subr.bf16.mxu1 %v2230_v60  ;;  %v2630_v59 = vld [vmem:[%s3399_s5 + $0x58] sm:$0xff]   ;;  %v2635_v0 = vld [vmem:[%s3399_s5 + $0xe0] sm:$0xff]   ;;  %v2643_v41 = vld [vmem:[%s3399_s5 + $0xf0] sm:$0xff]  }
 0x156   :  { %1382 = vmatprep.mubr.bf16.mxu0 %v2706_v43  ;;  %1423 = vmatprep.mubr.bf16.mxu1 %v2706_v43  ;;  %v869_v43 = vld [vmem:[%s3397_s3 + $0x118] sm:$0xff] }
 0x157   :  { %v2254_v13 = vcombine.high %v869_v43, %v873_v9  ;;  %v2253_v19 = vcombine.low %v869_v43, %v873_v9  ;;  %v2631_v60 = vld [vmem:[%s3399_s5 + $0xd8] sm:$0xff]   ;;  %v2650_v43 = vld [vmem:[%s3399_s5 + $0x140] sm:$0xff]  }
 0x158   :  { %1353 = vmatpush1.bf16.msra.mxu0 %v2227_v1  ;;  %1394 = vmatpush1.bf16.msra.mxu1 %v2229_v2  ;;  %v2636_v1 = vld [vmem:[%s3399_s5 + $0x20] sm:$0xff]  }
 0x159   :  { %1354 = vmatprep.subr.bf16.mxu0 %v2236_v3  ;;  %1395 = vmatprep.subr.bf16.mxu1 %v2238_v4  ;;  %v2637_v2 = vld [vmem:[%s3399_s5 + $0xa0] sm:$0xff]   ;;  %v2638_v3 = vld [vmem:[%s3399_s5 + $0x68] sm:$0xff]  }
 0x15a   :  { %v2639_v4 = vld [vmem:[%s3399_s5 + $0xe8] sm:$0xff]   ;;  %v2651_v9 = vld [vmem:[%s3399_s5 + $0x1c0] sm:$0xff]  }
 0x15c   :  { %1355 = vmatpush1.bf16.msra.mxu0 %v2235_v42  ;;  %1396 = vmatpush1.bf16.msra.mxu1 %v2237_v44  ;;  %v2644_v42 = vld [vmem:[%s3399_s5 + $0x30] sm:$0xff]  }
 0x15d   :  { %1356 = vmatprep.subr.bf16.mxu0 %v2244_v46  ;;  %1397 = vmatprep.subr.bf16.mxu1 %v2246_v47  ;;  %v2645_v44 = vld [vmem:[%s3399_s5 + $0xb0] sm:$0xff]   ;;  %v2646_v46 = vld [vmem:[%s3399_s5 + $0x78] sm:$0xff]  }
 0x15e   :  { %v2647_v47 = vld [vmem:[%s3399_s5 + $0xf8] sm:$0xff]  }
 0x160   :  { %1357 = vmatpush1.bf16.msra.mxu0 %v2243_v10  ;;  %1398 = vmatpush1.bf16.msra.mxu1 %v2245_v11  ;;  %v900_v10 = vlaneseq }
 0x161   :  { %1358 = vmatprep.subr.bf16.mxu0 %v2252_v12  ;;  %1399 = vmatprep.subr.bf16.mxu1 %v2254_v13 }
 0x162   :  { %v3266_v11 = vshrl.u32 %v900_v10, 7  ;;  %v2677_v10 = vld [vmem:[%s3399_s5 + $0x1b0] sm:$0xff]  }
 0x164   :  { %1359 = vmatpush1.bf16.msra.mxu0 %v2251_v18  ;;  %1400 = vmatpush1.bf16.msra.mxu1 %v2253_v19  ;;  %v902_v12 = vsub.s32 0, %v3266_v11  ;;  %v910_v13 = vsub.s32 2, %v3266_v11  ;;  %v906_v15 = vsub.s32 1, %v3266_v11  ;;  %v914_v16 = vsub.s32 3, %v3266_v11 }
 0x165   :  { %1360 = vmatprep.subr.bf16.mxu0 %v2260_v21  ;;  %1401 = vmatprep.subr.bf16.mxu1 %v2262_v22 }
 0x166   :  { %v903_v17 = vrot.slane %v3273_v14, %v902_v12  ;;  %v911_v18 = vrot.slane %v3273_v14, %v910_v13  ;;  %v907_v19 = vrot.slane %v3273_v14, %v906_v15  ;;  %v915_v21 = vrot.slane %v3273_v14, %v914_v16  ;;  %v2679_v12 = vld [vmem:[%s3399_s5 + $0x1f8] sm:$0xff]  }
 0x168   :  { %1361 = vmatpush1.bf16.msra.mxu0 %v2259_v27  ;;  %1402 = vmatpush1.bf16.msra.mxu1 %v2261_v28 }
 0x169   :  { %1362 = vmatprep.subr.bf16.mxu0 %v2268_v29  ;;  %1403 = vmatprep.subr.bf16.mxu1 %v2270_v30 }
 0x16c   :  { %1363 = vmatpush1.bf16.msra.mxu0 %v2267_v35  ;;  %1404 = vmatpush1.bf16.msra.mxu1 %v2269_v36 }
 0x16d   :  { %1364 = vmatprep.subr.bf16.mxu0 %v2276_v49  ;;  %1405 = vmatprep.subr.bf16.mxu1 %v2278_v37 }
 0x170   :  { %1365 = vmatpush1.bf16.msra.mxu0 %v2275_v38  ;;  %1406 = vmatpush1.bf16.msra.mxu1 %v2277_v39  ;;  %v2652_v39 = vld [vmem:[%s3399_s5 + $0x100] sm:$0xff]  }
 0x171   :  { %2392 = vmatprep.subr.bf16.mxu0 %v2618_v45  ;;  %2414 = vmatprep.subr.bf16.mxu1 %v2619_v48  ;;  %v2653_v45 = vld [vmem:[%s3399_s5 + $0x180] sm:$0xff]  }
 0x173   :  { %1383 = vmatmul.mubr.bf16.vlgmr.msra.gmra.mrb[36].mxu0 %v3078_v58  ;;  %1424 = vmatmul.mubr.bf16.vlgmr.msra.gmra.mrb[36].mxu1 %v3078_v58  ;;  %v2629_v58 = vld [vmem:[%s3399_s5 + $0x90] sm:$0xff]  }
 0x174   :  { %2393 = vmatpush3.bf16.msra.mxu0 %v2620_v50  ;;  %2415 = vmatpush3.bf16.msra.mxu1 %v2621_v51  ;;  %v2654_v51 = vld [vmem:[%s3399_s5 + $0x148] sm:$0xff]  }
 0x175   :  { %2394 = vmatprep.subr.bf16.mxu0 %v2622_v52  ;;  %2416 = vmatprep.subr.bf16.mxu1 %v2623_v53  ;;  %v2655_v52 = vld [vmem:[%s3399_s5 + $0x1c8] sm:$0xff]  }
 0x176   :  { %v2656_v53 = vld [vmem:[%s3399_s5 + $0x108] sm:$0xff]  }
 0x178   :  { %2395 = vmatpush3.bf16.msra.mxu0 %v2624_v54  ;;  %2417 = vmatpush3.bf16.msra.mxu1 %v2625_v55  ;;  %v2657_v54 = vld [vmem:[%s3399_s5 + $0x188] sm:$0xff]   ;;  %v2658_v55 = vld [vmem:[%s3399_s5 + $0x150] sm:$0xff]  }
 0x179   :  { %2396 = vmatprep.subr.bf16.mxu0 %v2626_v20  ;;  %2418 = vmatprep.subr.bf16.mxu1 %v2627_v56  ;;  %v2659_v20 = vld [vmem:[%s3399_s5 + $0x1d0] sm:$0xff]  }
 0x17a   :  { %v2660_v56 = vld [vmem:[%s3399_s5 + $0x110] sm:$0xff]  }
 0x17c   :  { %2397 = vmatpush3.bf16.msra.mxu0 %v2628_v57  ;;  %2419 = vmatpush3.bf16.msra.mxu1 %v2629_v58  ;;  %v2661_v57 = vld [vmem:[%s3399_s5 + $0x190] sm:$0xff]   ;;  %v2662_v58 = vld [vmem:[%s3399_s5 + $0x158] sm:$0xff]  }
 0x17d   :  { %2398 = vmatprep.subr.bf16.mxu0 %v2630_v59  ;;  %2420 = vmatprep.subr.bf16.mxu1 %v2631_v60  ;;  %v2663_v59 = vld [vmem:[%s3399_s5 + $0x1d8] sm:$0xff]  }
 0x17e   :  { %v2664_v60 = vld [vmem:[%s3399_s5 + $0x118] sm:$0xff]  }
 0x180   :  { %2399 = vmatpush3.bf16.msra.mxu0 %v2632_v61  ;;  %2421 = vmatpush3.bf16.msra.mxu1 %v2633_v62  ;;  %v2665_v61 = vld [vmem:[%s3399_s5 + $0x198] sm:$0xff]   ;;  %v2666_v62 = vld [vmem:[%s3399_s5 + $0x160] sm:$0xff]  }
 0x181   :  { %2400 = vmatprep.subr.bf16.mxu0 %v2634_v63  ;;  %2422 = vmatprep.subr.bf16.mxu1 %v2635_v0  ;;  %v2667_v63 = vld [vmem:[%s3399_s5 + $0x1e0] sm:$0xff]  }
 0x182   :  { %v2668_v0 = vld [vmem:[%s3399_s5 + $0x120] sm:$0xff]  }
 0x184   :  { %2401 = vmatpush3.bf16.msra.mxu0 %v2636_v1  ;;  %2423 = vmatpush3.bf16.msra.mxu1 %v2637_v2  ;;  %v2669_v1 = vld [vmem:[%s3399_s5 + $0x1a0] sm:$0xff]   ;;  %v2670_v2 = vld [vmem:[%s3399_s5 + $0x168] sm:$0xff]  }
 0x185   :  { %2402 = vmatprep.subr.bf16.mxu0 %v2638_v3  ;;  %2424 = vmatprep.subr.bf16.mxu1 %v2639_v4  ;;  %v2671_v3 = vld [vmem:[%s3399_s5 + $0x1e8] sm:$0xff]   ;;  %v918_v4 = vsub.s32 4, %v3266_v11 }
 0x188   :  { %2403 = vmatpush3.bf16.msra.mxu0 %v2640_v5  ;;  %2425 = vmatpush3.bf16.msra.mxu1 %v2641_v6  ;;  %v926_v5 = vsub.s32 6, %v3266_v11  ;;  %v2672_v6 = vld [vmem:[%s3399_s5 + $0x128] sm:$0xff]  }
 0x189   :  { %2404 = vmatprep.subr.bf16.mxu0 %v2642_v40  ;;  %2426 = vmatprep.subr.bf16.mxu1 %v2643_v41  ;;  %v2673_v40 = vld [vmem:[%s3399_s5 + $0x1a8] sm:$0xff]   ;;  %v922_v41 = vsub.s32 5, %v3266_v11 }
 0x18c   :  { %2405 = vmatpush3.bf16.msra.mxu0 %v2644_v42  ;;  %2427 = vmatpush3.bf16.msra.mxu1 %v2645_v44  ;;  %v930_v42 = vsub.s32 7, %v3266_v11  ;;  %v2674_v44 = vld [vmem:[%s3399_s5 + $0x170] sm:$0xff]   ;;  %v2678_v11 = vld [vmem:[%s3399_s5 + $0x178] sm:$0xff]  }
 0x18d   :  { %2406 = vmatprep.subr.bf16.mxu0 %v2646_v46  ;;  %2428 = vmatprep.subr.bf16.mxu1 %v2647_v47  ;;  %v2675_v46 = vld [vmem:[%s3399_s5 + $0x1f0] sm:$0xff]   ;;  %v919_v47 = vrot.slane %v3273_v14, %v918_v4 }
 0x190   :  { %2407 = vmatpush3.bf16.msra.mxu0 %v2648_v7  ;;  %2429 = vmatpush3.bf16.msra.mxu1 %v2649_v8  ;;  %v927_v7 = vrot.slane %v3273_v14, %v926_v5  ;;  %v923_v8 = vrot.slane %v3273_v14, %v922_v41 }
 0x191   :  { %2436 = vmatprep.subr.bf16.mxu0 %v2650_v43  ;;  %2458 = vmatprep.subr.bf16.mxu1 %v2651_v9  ;;  %v931_v43 = vrot.slane %v3273_v14, %v930_v42  ;;  %v2676_v9 = vld [vmem:[%s3399_s5 + $0x130] sm:$0xff]  }
 0x226   :  { %v1302_v22 = vpop.f32.mrb[32].mxu0  ;;  %v1343_v23 = vpop.f32.mrb[32].mxu1 }
 0x227   :  { %v1303_v24 = vadd.f32 %v1302_v22, %v903_v17  ;;  %v1344_v25 = vadd.f32 %v1343_v23, %v911_v18  ;;  %v1304_v26 = vpop.f32.mrb[33].mxu0  ;;  %v1345_v27 = vpop.f32.mrb[33].mxu1 }
 0x228   :  { %v1305_v28 = vadd.f32 %v1304_v26, %v907_v19  ;;  %v1346_v29 = vadd.f32 %v1345_v27, %v915_v21  ;;  %v1306_v30 = vpop.f32.mrb[34].mxu0  ;;  %v1347_v31 = vpop.f32.mrb[34].mxu1 }
 0x229   :  { %v1432_v32 = vmax.f32 %v1303_v24, 0.0  ;;  %v1434_v33 = vmax.f32 %v1344_v25, 0.0  ;;  %v1307_v34 = vpop.f32.mrb[35].mxu0  ;;  %v1348_v35 = vpop.f32.mrb[35].mxu1  ;;  %v2680_v24 = vld [vmem:[%s3399_s5 + $0x138] sm:$0xff]  }
 0x22a   :  { %v1433_v36 = vmax.f32 %v1305_v28, 0.0  ;;  %v1435_v49 = vmax.f32 %v1346_v29, 0.0  ;;  %v2681_v25 = vld [vmem:[%s3399_s5 + $0x1b8] sm:$0xff]  }
 0x22b   :  { %v1440_v48 = vpack.c.bf16 %v1432_v32, %v1432_v32  ;;  %v1442_v50 = vpack.c.bf16 %v1434_v33, %v1434_v33 }
 0x22c   :  { %v1441_v37 = vpack.c.bf16 %v1433_v36, %v1433_v36  ;;  %v1443_v38 = vpack.c.bf16 %v1435_v49, %v1435_v49 }
 0x22e   :  { %1999 = vmatprep.mubr.bf16.mxu0 %v1441_v37  ;;  %2039 = vmatprep.mubr.bf16.mxu1 %v1443_v38  ;;  %v2279_v37 = vld [vmem:[%s3400_s6] ss:$0 sm:$0xff]  ;;  %s2707_s6 = smov [#allocation2]  }
 0x22f   :  { %2000 = vmatmul.mubr.bf16.vlgmr.msra.gmra.mrb[40].mxu0 %v1440_v48  ;;  %2040 = vmatmul.mubr.bf16.vlgmr.msra.gmra.mrb[40].mxu1 %v1442_v50  ;;  %s2134_s28 = sshll.u32 %s2707_s6, 4  ;;  %s2135_s28 = int_to_ptr.vmem [resolvable:$true] %s2134_s28 }
 0x230   :  { %2437 = vmatpush3.bf16.msra.mxu0 %v2652_v39  ;;  %2459 = vmatpush3.bf16.msra.mxu1 %v2653_v45  ;;  %s2682_s29 = scalar_lea.vmem %s2135_s28, 32  ;;  %p2687_p1 = scmp.lt.s32.totalorder %s2135_s28, %s2135_s28 }
 0x231   :  { %2438 = vmatprep.subr.bf16.mxu0 %v2654_v51  ;;  %2460 = vmatprep.subr.bf16.mxu1 %v2655_v52  ;;  %p2683_p0 = scmp.ne.s32.totalorder %s2135_s28, %s2682_s29  ;;  %p2688_p2 = scmp.lt.s32.totalorder %s2682_s29, %s2682_s29 }
 0x233   :  { %p2689_p3 = por %p2688_p2, %p2687_p1 }
 0x234   :  { %2439 = vmatpush3.bf16.msra.mxu0 %v2656_v53  ;;  %2461 = vmatpush3.bf16.msra.mxu1 %v2657_v54 }
 0x235   :  { %2440 = vmatprep.subr.bf16.mxu0 %v2658_v55  ;;  %2462 = vmatprep.subr.bf16.mxu1 %v2659_v20  ;;  %p2690_p4 = pnand %p2689_p3, %p2683_p0 }
 0x238   :  { %2441 = vmatpush3.bf16.msra.mxu0 %v2660_v56  ;;  %2463 = vmatpush3.bf16.msra.mxu1 %v2661_v57 }
 0x239   :  { %2442 = vmatprep.subr.bf16.mxu0 %v2662_v58  ;;  %2464 = vmatprep.subr.bf16.mxu1 %v2663_v59 }
 0x23c   :  { %2443 = vmatpush3.bf16.msra.mxu0 %v2664_v60  ;;  %2465 = vmatpush3.bf16.msra.mxu1 %v2665_v61 }
 0x23d   :  { %2444 = vmatprep.subr.bf16.mxu0 %v2666_v62  ;;  %2466 = vmatprep.subr.bf16.mxu1 %v2667_v63 }
 0x240   :  { %2445 = vmatpush3.bf16.msra.mxu0 %v2668_v0  ;;  %2467 = vmatpush3.bf16.msra.mxu1 %v2669_v1 }
 0x241   :  { %2446 = vmatprep.subr.bf16.mxu0 %v2670_v2  ;;  %2468 = vmatprep.subr.bf16.mxu1 %v2671_v3 }
 0x244   :  { %2447 = vmatpush3.bf16.msra.mxu0 %v2672_v6  ;;  %2469 = vmatpush3.bf16.msra.mxu1 %v2673_v40 }
 0x245   :  { %2448 = vmatprep.subr.bf16.mxu0 %v2674_v44  ;;  %2470 = vmatprep.subr.bf16.mxu1 %v2675_v46 }
 0x246   :  { %v1384_v13 = vpop.f32.mrb[36].mxu0  ;;  %v1425_v14 = vpop.f32.mrb[36].mxu1 }
 0x247   :  { %v1385_v15 = vadd.f32 %v1384_v13, %v919_v47  ;;  %v1426_v16 = vadd.f32 %v1425_v14, %v927_v7  ;;  %v1386_v17 = vpop.f32.mrb[37].mxu0  ;;  %v1427_v18 = vpop.f32.mrb[37].mxu1 }
 0x248   :  { %v1387_v19 = vadd.f32 %v1386_v17, %v923_v8  ;;  %v1428_v21 = vadd.f32 %v1427_v18, %v931_v43  ;;  %v1388_v22 = vpop.f32.mrb[38].mxu0  ;;  %v1429_v23 = vpop.f32.mrb[38].mxu1  ;;  %2449 = vmatpush3.bf16.msra.mxu0 %v2676_v9  ;;  %2471 = vmatpush3.bf16.msra.mxu1 %v2677_v10 }
 0x249   :  { %v1436_v26 = vmax.f32 %v1385_v15, 0.0  ;;  %v1438_v27 = vmax.f32 %v1426_v16, 0.0  ;;  %v1389_v28 = vpop.f32.mrb[39].mxu0  ;;  %v1430_v29 = vpop.f32.mrb[39].mxu1  ;;  %2450 = vmatprep.subr.bf16.mxu0 %v2678_v11  ;;  %2472 = vmatprep.subr.bf16.mxu1 %v2679_v12 }
 0x24a   :  { %v1437_v30 = vmax.f32 %v1387_v19, 0.0  ;;  %v1439_v31 = vmax.f32 %v1428_v21, 0.0 }
 0x24b   :  { %v1444_v34 = vpack.c.bf16 %v1436_v26, %v1436_v26  ;;  %v1446_v35 = vpack.c.bf16 %v1438_v27, %v1438_v27 }
 0x24c   :  { %v1445_v32 = vpack.c.bf16 %v1437_v30, %v1437_v30  ;;  %v1447_v33 = vpack.c.bf16 %v1439_v31, %v1439_v31  ;;  %2451 = vmatpush3.bf16.msra.mxu0 %v2680_v24  ;;  %2473 = vmatpush3.bf16.msra.mxu1 %v2681_v25 }
 0x24e   :  { %2079 = vmatprep.mubr.bf16.mxu0 %v1445_v32  ;;  %2119 = vmatprep.mubr.bf16.mxu1 %v1447_v33 }
 0x24f   :  { %2080 = vmatmul.mubr.bf16.vlgmr.msra.gmra.mrb[44].mxu0 %v1444_v34  ;;  %2120 = vmatmul.mubr.bf16.vlgmr.msra.gmra.mrb[44].mxu1 %v1446_v35 }
 0x302   :  { %v2408_v36 = vpop.f32.mrb[40].mxu0  ;;  %v2430_v49 = vpop.f32.mrb[40].mxu1 }
 0x303   :  { %v2409_v38 = vpop.f32.mrb[41].mxu0  ;;  %v2431_v39 = vpop.f32.mrb[41].mxu1 }
 0x304   :  { %v2410_v45 = vadd.f32 %v2409_v38, %v2408_v36  ;;  %v2432_v48 = vadd.f32 %v2431_v39, %v2430_v49  ;;  %v2411_v50 = vpop.f32.mrb[42].mxu0  ;;  %v2433_v51 = vpop.f32.mrb[42].mxu1 }
 0x305   :  { %v2412_v52 = vpop.f32.mrb[43].mxu0  ;;  %v2434_v53 = vpop.f32.mrb[43].mxu1 }
 0x306   :  { %v2002_v54 = vadd.f32 %v2410_v45, %v2279_v37 }
 0x308   :  { %v2042_v55 = vadd.f32 %v2432_v48, %v2002_v54 }
 0x322   :  { %v2452_v20 = vpop.f32.mrb[44].mxu0  ;;  %v2474_v56 = vpop.f32.mrb[44].mxu1 }
 0x323   :  { %v2453_v57 = vpop.f32.mrb[45].mxu0  ;;  %v2475_v58 = vpop.f32.mrb[45].mxu1 }
 0x324   :  { %v2454_v59 = vadd.f32 %v2453_v57, %v2452_v20  ;;  %v2476_v60 = vadd.f32 %v2475_v58, %v2474_v56  ;;  %v2455_v61 = vpop.f32.mrb[46].mxu0  ;;  %v2477_v62 = vpop.f32.mrb[46].mxu1 }
 0x325   :  { %v2456_v63 = vpop.f32.mrb[47].mxu0  ;;  %v2478_v0 = vpop.f32.mrb[47].mxu1 }
 0x326   :  { %v2082_v1 = vadd.f32 %v2454_v59, %v2042_v55 }
 0x328   :  { %v2122_v2 = vadd.f32 %v2476_v60, %v2082_v1 }
 0x32a   :  { %2127 = vst [vmem:[#allocation2] sm:$0x3] %v2122_v2 }
 0x32b   :  { %2693 = shalt.err (!%p2690_p4)
}
 0x32c   :  { %s2694_s8 = scalar_lea.hbm %s3401_s7, 32 }
 0x32d   :  { %p2695_p5 = scmp.ne.s32.totalorder %s3401_s7, %s2694_s8  ;;  %p2698_p6 = scmp.lt.u32.totalorder %s2694_s8, %s3401_s7 }
 0x32f   :  { %p2700_p7 = pnand %p2698_p6, %p2695_p5 }
 0x331   :  { %2703 = shalt.err (!%p2700_p7)
}
 0x332   :  { %2137 = dma.vmem_to_hbm [thread:$0]  %s2135_s28, 32, %s3401_s7, [#allocation3]  }
 0x333   :  { %2704 = dma.done.wait [#allocation3], 32  }
 0x334   :  { %2705 = vsyncadd [#allocation3], 4294967264 }
 0x335   :  { %2141 = vsyncpa [#allocation3], 1 }

</bundles_post_ra>
